<compile_context>
chip_gen: v6e
topology: v6e:2x2x1
jax: 0.10.0
libtpu: 0.0.40
codegen_flags: <defaults>
</compile_context>

<pallas_src>
import numpy as np

import jax
import jax.numpy as jnp
from jax.experimental import pallas as pl
from jax.experimental.pallas import tpu as pltpu

MXU_DTYPE = jnp.bfloat16  # matmul input dtype; accumulation is always float32


# ----------------------------------------------------------------------------
# Fused kernel: one batch tile (BT images) per grid step, all VMEM-resident.
# ----------------------------------------------------------------------------
def _fused_features_kernel(x_ref, s1_ref, a1_ref, bt1_ref,
                           s2_ref, a2_ref, bt2_ref,
                           s3_ref, a3_ref, bt3_ref,
                           w4_ref, b4_ref, o_ref):

    def conv3x3_s2(act, s_ref, a_ref, bt_ref):
        # act:    (M_in,  W_in*C_in)   bf16, batch-stacked HWC-flattened rows
        # s_ref:  (3, M_out, M_in)     constant 0/1 row-selection (host-built)
        # a_ref:  (3, W_in*C_in, W_out*C_out) row-GEMM conv weights (bf16)
        # bt_ref: (1, W_out*C_out)     bias tiled over output columns (f32)
        m_out = s_ref.shape[1]
        n_out = a_ref.shape[-1]
        acc = jnp.zeros((m_out, n_out), jnp.float32)
        for kh in range(3):
            # Row gather (stride-2 + padding + per-image blocks) as a matmul
            # against a precomputed constant -- no iota/where per step.
            x_kh = jnp.dot(s_ref[kh], act, preferred_element_type=jnp.float32)
            x_kh = x_kh.astype(act.dtype)   # exact: pure 0/1 selection of bf16
            acc = acc + jnp.dot(x_kh, a_ref[kh],
                                preferred_element_type=jnp.float32)
        y = acc + bt_ref[...]               # bias in f32
        # SiLU = y * sigmoid(y); exp + reciprocal both run on the EUP slot.
        z = jnp.exp(jnp.minimum(-y, 80.0))
        return y * pl.reciprocal(1.0 + z, approx=True)

    x = x_ref[...]                                             # (BT*H, W*C) bf16
    y1 = conv3x3_s2(x, s1_ref, a1_ref, bt1_ref)                # (BT*H/2, W/2*32)
    y2 = conv3x3_s2(y1.astype(x.dtype), s2_ref, a2_ref, bt2_ref)  # (BT*H/4, ...)
    y3 = conv3x3_s2(y2.astype(x.dtype), s3_ref, a3_ref, bt3_ref)  # (BT*H/8, ...)
    y3 = y3.astype(x.dtype)            # rows are h-major: row = i*BT + b

    # Flatten + Linear: w4 was pre-permuted to NHWC row order and padded to a
    # lane-dense output width; H//8 GEMMs with M=BT each (not M=1 mat-vecs).
    nbt = o_ref.shape[0]
    h3 = w4_ref.shape[0]
    acc4 = jnp.zeros((nbt, w4_ref.shape[-1]), jnp.float32)
    for i in range(h3):
        acc4 = acc4 + jnp.dot(y3[i * nbt:(i + 1) * nbt, :], w4_ref[i],
                              preferred_element_type=jnp.float32)
    o_ref[...] = (acc4 + b4_ref[...]).astype(o_ref.dtype)


# ----------------------------------------------------------------------------
# Host-side constant builders
# ----------------------------------------------------------------------------
def _make_selection(bt, h_in, h_out, out_h_major):
    """0/1 row-selection matrices, shape (3, bt*h_out, bt*h_in).

    For kernel-row kh, output row r (image b, conv output row i) selects input
    row 2*i + kh - 1 of image b (zero row for the padding positions).  Input
    rows are b-major (row = b*h_in + h).  Output rows are b-major
    (b*h_out + i) or h-major (i*bt + b)."""
    s = np.zeros((3, bt * h_out, bt * h_in), np.float32)
    for kh in range(3):
        for b in range(bt):
            for i in range(h_out):
                h_src = 2 * i + kh - 1
                if 0 <= h_src < h_in:
                    r = i * bt + b if out_h_major else b * h_out + i
                    s[kh, r, b * h_in + h_src] = 1.0
    return s


def _conv_to_rowgemm(w, w_in):
    """w: torch-layout (C_out, C_in, 3, 3) -> (3, W_in*C_in, W_out*C_out).
    Folds the W-stride (2), the W zero padding (1) and the conv weights into
    one matrix per kernel row kh."""
    c_out, c_in, _, _ = w.shape
    w_out = w_in // 2
    a = np.zeros((3, w_in * c_in, w_out * c_out), np.float32)
    for kh in range(3):
        for j in range(w_out):
            for kw in range(3):
                col = 2 * j + kw - 1          # input column (padding = 1)
                if 0 <= col < w_in:
                    a[kh,
                      col * c_in:(col + 1) * c_in,
                      j * c_out:(j + 1) * c_out] = w[:, :, kh, kw].T
    return a


# ----------------------------------------------------------------------------
# Forward wrapper
# ----------------------------------------------------------------------------
def model_features_forward(x_nchw, params):
    B, C, H, W = x_nchw.shape
    h1, h2, h3 = H // 2, H // 4, H // 8

    a1, a2, a3 = params["a1"], params["a2"], params["a3"]
    bt1, bt2, bt3 = params["bt1"], params["bt2"], params["bt3"]
    w4p, b4 = params["w4p"], params["b4"]
    nf = b4.shape[-1]
    nf_pad = w4p.shape[-1]

    # Batch tile: stack BT images along the M axis of every GEMM.  BT=8 keeps
    # the out-block sublane dim 8-aligned when the grid has >1 step.
    bt = B if B <= 8 else 8
    b_pad = -(-B // bt) * bt
    n_steps = b_pad // bt

    # NCHW -> batch-stacked HWC-flattened rows: row (b*H + h), col (w*C + c).
    x_rows = jnp.transpose(x_nchw, (0, 2, 3, 1)).reshape(B, H, W * C)
    x_rows = x_rows.astype(MXU_DTYPE)
    if b_pad != B:
        x_rows = jnp.pad(x_rows, ((0, b_pad - B), (0, 0), (0, 0)))
    x_rows = x_rows.reshape(b_pad * H, W * C)

    # Compile-time 0/1 selection constants (block-diagonal over the batch tile).
    s1 = jnp.asarray(_make_selection(bt, H,  h1, out_h_major=False), MXU_DTYPE)
    s2 = jnp.asarray(_make_selection(bt, h1, h2, out_h_major=False), MXU_DTYPE)
    s3 = jnp.asarray(_make_selection(bt, h2, h3, out_h_major=True),  MXU_DTYPE)

    b4p = jnp.pad(b4, ((0, 0), (0, nf_pad - nf)))     # lane-dense FC bias

    inputs = (x_rows, s1, a1, bt1, s2, a2, bt2, s3, a3, bt3, w4p, b4p)

    def full_spec(arr):
        zeros = (0,) * arr.ndim
        return pl.BlockSpec(arr.shape, lambda t, z=zeros: z)

    in_specs = [pl.BlockSpec((bt * H, W * C), lambda t: (t, 0))]
    in_specs += [full_spec(a) for a in inputs[1:]]

    # Cost estimate (advisory) + explicit VMEM budget.
    def _mm(m, k, n):
        return 2 * m * k * n
    conv_dims = [
        (bt * H,  bt * h1, W * C,          (W // 2) * 32),
        (bt * h1, bt * h2, (W // 2) * 32,  (W // 4) * 64),
        (bt * h2, bt * h3, (W // 4) * 64,  (W // 8) * 64),
    ]
    flops_step = 0
    trans_step = 0
    for m_in, m_out, k_in, n_out in conv_dims:
        flops_step += 3 * (_mm(m_out, m_in, k_in) + _mm(m_out, k_in, n_out))
        trans_step += m_out * n_out
    flops_step += h3 * _mm(bt, (W // 8) * 64, nf_pad)
    in_bytes = sum(int(a.size) * a.dtype.itemsize for a in inputs)
    out_bytes = b_pad * nf_pad * 4
    cost = pl.CostEstimate(flops=int(n_steps * flops_step),
                           transcendentals=int(n_steps * trans_step),
                           bytes_accessed=int(in_bytes + out_bytes))
    vmem_limit = int(min(64 << 20,
                         max(32 << 20, 2 * in_bytes + out_bytes + (8 << 20))))

    out = pl.pallas_call(
        _fused_features_kernel,
        out_shape=jax.ShapeDtypeStruct((b_pad, nf_pad), jnp.float32),
        grid=(n_steps,),
        in_specs=in_specs,
        out_specs=pl.BlockSpec((bt, nf_pad), lambda t: (t, 0)),
        compiler_params=pltpu.CompilerParams(
            dimension_semantics=("parallel",),
            vmem_limit_bytes=vmem_limit),
        cost_estimate=cost,
    )(*inputs)

    return out[:B, :nf]


# ----------------------------------------------------------------------------
# Parameter construction (orthogonal gain=0.5 weights, zero biases, like torch)
# folded into the fused-kernel layout.
# ----------------------------------------------------------------------------
def init_params(key, in_channels, H, W, n_features):
    assert H % 8 == 0 and W % 8 == 0
    ortho = jax.nn.initializers.orthogonal(scale=0.5)
    k1, k2, k3, k4 = jax.random.split(key, 4)

    # torch-layout weights (C_out, C_in, kH, kW) / (out_f, in_f), zero biases
    w1 = np.asarray(ortho(k1, (32, in_channels * 9), jnp.float32)
                    ).reshape(32, in_channels, 3, 3)
    w2 = np.asarray(ortho(k2, (64, 32 * 9), jnp.float32)).reshape(64, 32, 3, 3)
    w3 = np.asarray(ortho(k3, (64, 64 * 9), jnp.float32)).reshape(64, 64, 3, 3)
    fc_in = 64 * (H // 8) * (W // 8)
    w4 = np.asarray(ortho(k4, (n_features, fc_in), jnp.float32))
    b1 = np.zeros(32, np.float32)
    b2 = np.zeros(64, np.float32)
    b3 = np.zeros(64, np.float32)
    b4 = np.zeros(n_features, np.float32)

    # conv -> row-GEMM matrices; biases tiled over the W_out*C_out lane layout
    a1 = _conv_to_rowgemm(w1, W)
    a2 = _conv_to_rowgemm(w2, W // 2)
    a3 = _conv_to_rowgemm(w3, W // 4)
    bt1 = np.tile(b1, W // 2)[None, :]
    bt2 = np.tile(b2, W // 4)[None, :]
    bt3 = np.tile(b3, W // 8)[None, :]

    # Linear weight permuted so it contracts against NHWC-ordered rows, padded
    # to a lane-dense (multiple-of-128) output width:
    # w4p[i, j*64 + c, k] = w4[k, c*(H//8)*(W//8) + i*(W//8) + j]
    ho3, wo3 = H // 8, W // 8
    nf_pad = -(-n_features // 128) * 128
    w4p = (w4.reshape(n_features, 64, ho3, wo3)
             .transpose(2, 3, 1, 0)
             .reshape(ho3, wo3 * 64, n_features))
    w4p = np.pad(w4p, ((0, 0), (0, 0), (0, nf_pad - n_features)))

    to_mxu = lambda x: jnp.asarray(x, MXU_DTYPE)
    params = dict(
        a1=to_mxu(a1), a2=to_mxu(a2), a3=to_mxu(a3),
        bt1=jnp.asarray(bt1), bt2=jnp.asarray(bt2), bt3=jnp.asarray(bt3),
        w4p=to_mxu(w4p), b4=jnp.asarray(b4[None, :]),
    )
    ref_params = dict(w1=jnp.asarray(w1), b1=jnp.asarray(b1),
                      w2=jnp.asarray(w2), b2=jnp.asarray(b2),
                      w3=jnp.asarray(w3), b3=jnp.asarray(b3),
                      w4=jnp.asarray(w4), b4=jnp.asarray(b4))
    return params, ref_params


# ----------------------------------------------------------------------------
# Pure-JAX float32 reference (matches the torch module exactly)
# ----------------------------------------------------------------------------
def model_features_reference(x_nchw, rp):
    def conv(x, w, b):
        y = jax.lax.conv_general_dilated(
            x, w, window_strides=(2, 2), padding=((1, 1), (1, 1)),
            dimension_numbers=("NCHW", "OIHW", "NCHW"))
        return y + b[None, :, None, None]

    silu = lambda z: z * jax.nn.sigmoid(z)
    x = silu(conv(x_nchw, rp["w1"], rp["b1"]))
    x = silu(conv(x, rp["w2"], rp["b2"]))
    x = silu(conv(x, rp["w3"], rp["b3"]))
    x = x.reshape(x.shape[0], -1)                 # NCHW flatten, like torch
    return x @ rp["w4"].T + rp["b4"][None, :]


if __name__ == "__main__":
    key = jax.random.PRNGKey(0)
    k_x, k_p = jax.random.split(key)

    B, C, H, W = 2, 4, 16, 16      # input_shape = (4, 16, 16), batch 2
    n_features = 32

    x = jax.random.normal(k_x, (B, C, H, W), dtype=jnp.float32)
    params, ref_params = init_params(k_p, C, H, W, n_features)

    fwd = jax.jit(model_features_forward)
    out = fwd(x, params)
    jax.block_until_ready(out)

    assert out.shape == (B, n_features), out.shape
    assert out.dtype == jnp.float32
    assert bool(jnp.all(jnp.isfinite(out)))

    ref = model_features_reference(x, ref_params)
    err = float(jnp.max(jnp.abs(out - ref)))
    assert err < 5e-2, f"max |kernel - reference| = {err}"

    print("KERNEL_OK")
</pallas_src>

<mosaic_0001>
module attributes {stable_mosaic.version = 11 : i64} {
  func.func @_fused_features_kernel(%arg0: i32, %arg1: memref<32x64xbf16, #tpu.memory_space<vmem>>, %arg2: memref<3x16x32xbf16, #tpu.memory_space<vmem>>, %arg3: memref<3x64x256xbf16, #tpu.memory_space<vmem>>, %arg4: memref<1x256xf32, #tpu.memory_space<vmem>>, %arg5: memref<3x8x16xbf16, #tpu.memory_space<vmem>>, %arg6: memref<3x256x256xbf16, #tpu.memory_space<vmem>>, %arg7: memref<1x256xf32, #tpu.memory_space<vmem>>, %arg8: memref<3x4x8xbf16, #tpu.memory_space<vmem>>, %arg9: memref<3x256x128xbf16, #tpu.memory_space<vmem>>, %arg10: memref<1x128xf32, #tpu.memory_space<vmem>>, %arg11: memref<2x128x128xbf16, #tpu.memory_space<vmem>>, %arg12: memref<1x128xf32, #tpu.memory_space<vmem>>, %arg13: memref<2x128xf32, #tpu.memory_space<vmem>>) attributes {dimension_semantics = [#tpu.dimension_semantics<parallel>], iteration_bounds = array<i64: 1>, scalar_prefetch = 0 : i64, scratch_operands = 0 : i64, tpu.core_type = #tpu.core_type<tc>, window_params = [{transform_indices = @transform_0, window_bounds = array<i64: 32, 64>}, {pipeline_mode = #tpu.pipeline_mode<synchronous>, transform_indices = @transform_1, window_bounds = array<i64: 3, 16, 32>}, {pipeline_mode = #tpu.pipeline_mode<synchronous>, transform_indices = @transform_2, window_bounds = array<i64: 3, 64, 256>}, {pipeline_mode = #tpu.pipeline_mode<synchronous>, transform_indices = @transform_3, window_bounds = array<i64: 1, 256>}, {pipeline_mode = #tpu.pipeline_mode<synchronous>, transform_indices = @transform_4, window_bounds = array<i64: 3, 8, 16>}, {pipeline_mode = #tpu.pipeline_mode<synchronous>, transform_indices = @transform_5, window_bounds = array<i64: 3, 256, 256>}, {pipeline_mode = #tpu.pipeline_mode<synchronous>, transform_indices = @transform_6, window_bounds = array<i64: 1, 256>}, {pipeline_mode = #tpu.pipeline_mode<synchronous>, transform_indices = @transform_7, window_bounds = array<i64: 3, 4, 8>}, {pipeline_mode = #tpu.pipeline_mode<synchronous>, transform_indices = @transform_8, window_bounds = array<i64: 3, 256, 128>}, {pipeline_mode = #tpu.pipeline_mode<synchronous>, transform_indices = @transform_9, window_bounds = array<i64: 1, 128>}, {pipeline_mode = #tpu.pipeline_mode<synchronous>, transform_indices = @transform_10, window_bounds = array<i64: 2, 128, 128>}, {pipeline_mode = #tpu.pipeline_mode<synchronous>, transform_indices = @transform_11, window_bounds = array<i64: 1, 128>}, {transform_indices = @transform_12, window_bounds = array<i64: 2, 128>}]} {
    %c0 = arith.constant 0 : index
    %c0_0 = arith.constant 0 : index
    %0 = vector.load %arg1[%c0, %c0_0] : memref<32x64xbf16, #tpu.memory_space<vmem>>, vector<32x64xbf16>
    %cst = arith.constant 0.000000e+00 : f32
    %1 = vector.broadcast %cst : f32 to vector<16x256xf32>
    %c0_1 = arith.constant 0 : index
    %c0_2 = arith.constant 0 : index
    %c0_3 = arith.constant 0 : index
    %2 = vector.load %arg2[%c0_1, %c0_2, %c0_3] : memref<3x16x32xbf16, #tpu.memory_space<vmem>>, vector<1x16x32xbf16>
    %3 = vector.shape_cast %2 : vector<1x16x32xbf16> to vector<16x32xbf16>
    %cst_4 = arith.constant dense<0.000000e+00> : vector<16x64xf32>
    %4 = tpu.matmul %3, %0, %cst_4 {dimension_numbers = #tpu.dot_dimension_numbers<[1], [0], [0], [1], [0, 0, 1, 1], [], []>} : vector<16x32xbf16>, vector<32x64xbf16>, vector<16x64xf32> -> vector<16x64xf32>
    %5 = arith.truncf %4 : vector<16x64xf32> to vector<16x64xbf16>
    %c0_5 = arith.constant 0 : index
    %c0_6 = arith.constant 0 : index
    %c0_7 = arith.constant 0 : index
    %6 = vector.load %arg3[%c0_5, %c0_6, %c0_7] : memref<3x64x256xbf16, #tpu.memory_space<vmem>>, vector<1x64x256xbf16>
    %7 = vector.shape_cast %6 : vector<1x64x256xbf16> to vector<64x256xbf16>
    %cst_8 = arith.constant dense<0.000000e+00> : vector<16x256xf32>
    %8 = tpu.matmul %5, %7, %cst_8 {dimension_numbers = #tpu.dot_dimension_numbers<[1], [0], [0], [1], [0, 0, 1, 1], [], []>} : vector<16x64xbf16>, vector<64x256xbf16>, vector<16x256xf32> -> vector<16x256xf32>
    %9 = arith.addf %1, %8 : vector<16x256xf32>
    %c1 = arith.constant 1 : index
    %c0_9 = arith.constant 0 : index
    %c0_10 = arith.constant 0 : index
    %10 = vector.load %arg2[%c1, %c0_9, %c0_10] : memref<3x16x32xbf16, #tpu.memory_space<vmem>>, vector<1x16x32xbf16>
    %11 = vector.shape_cast %10 : vector<1x16x32xbf16> to vector<16x32xbf16>
    %cst_11 = arith.constant dense<0.000000e+00> : vector<16x64xf32>
    %12 = tpu.matmul %11, %0, %cst_11 {dimension_numbers = #tpu.dot_dimension_numbers<[1], [0], [0], [1], [0, 0, 1, 1], [], []>} : vector<16x32xbf16>, vector<32x64xbf16>, vector<16x64xf32> -> vector<16x64xf32>
    %13 = arith.truncf %12 : vector<16x64xf32> to vector<16x64xbf16>
    %c1_12 = arith.constant 1 : index
    %c0_13 = arith.constant 0 : index
    %c0_14 = arith.constant 0 : index
    %14 = vector.load %arg3[%c1_12, %c0_13, %c0_14] : memref<3x64x256xbf16, #tpu.memory_space<vmem>>, vector<1x64x256xbf16>
    %15 = vector.shape_cast %14 : vector<1x64x256xbf16> to vector<64x256xbf16>
    %cst_15 = arith.constant dense<0.000000e+00> : vector<16x256xf32>
    %16 = tpu.matmul %13, %15, %cst_15 {dimension_numbers = #tpu.dot_dimension_numbers<[1], [0], [0], [1], [0, 0, 1, 1], [], []>} : vector<16x64xbf16>, vector<64x256xbf16>, vector<16x256xf32> -> vector<16x256xf32>
    %17 = arith.addf %9, %16 : vector<16x256xf32>
    %c2 = arith.constant 2 : index
    %c0_16 = arith.constant 0 : index
    %c0_17 = arith.constant 0 : index
    %18 = vector.load %arg2[%c2, %c0_16, %c0_17] : memref<3x16x32xbf16, #tpu.memory_space<vmem>>, vector<1x16x32xbf16>
    %19 = vector.shape_cast %18 : vector<1x16x32xbf16> to vector<16x32xbf16>
    %cst_18 = arith.constant dense<0.000000e+00> : vector<16x64xf32>
    %20 = tpu.matmul %19, %0, %cst_18 {dimension_numbers = #tpu.dot_dimension_numbers<[1], [0], [0], [1], [0, 0, 1, 1], [], []>} : vector<16x32xbf16>, vector<32x64xbf16>, vector<16x64xf32> -> vector<16x64xf32>
    %21 = arith.truncf %20 : vector<16x64xf32> to vector<16x64xbf16>
    %c2_19 = arith.constant 2 : index
    %c0_20 = arith.constant 0 : index
    %c0_21 = arith.constant 0 : index
    %22 = vector.load %arg3[%c2_19, %c0_20, %c0_21] : memref<3x64x256xbf16, #tpu.memory_space<vmem>>, vector<1x64x256xbf16>
    %23 = vector.shape_cast %22 : vector<1x64x256xbf16> to vector<64x256xbf16>
    %cst_22 = arith.constant dense<0.000000e+00> : vector<16x256xf32>
    %24 = tpu.matmul %21, %23, %cst_22 {dimension_numbers = #tpu.dot_dimension_numbers<[1], [0], [0], [1], [0, 0, 1, 1], [], []>} : vector<16x64xbf16>, vector<64x256xbf16>, vector<16x256xf32> -> vector<16x256xf32>
    %25 = arith.addf %17, %24 : vector<16x256xf32>
    %c0_23 = arith.constant 0 : index
    %c0_24 = arith.constant 0 : index
    %26 = vector.load %arg4[%c0_23, %c0_24] : memref<1x256xf32, #tpu.memory_space<vmem>>, vector<1x256xf32>
    %27 = vector.broadcast %26 : vector<1x256xf32> to vector<16x256xf32>
    %28 = arith.addf %25, %27 : vector<16x256xf32>
    %cst_25 = arith.constant 0.000000e+00 : f32
    %29 = vector.broadcast %cst_25 : f32 to vector<16x256xf32>
    %30 = arith.subf %29, %28 : vector<16x256xf32>
    %cst_26 = arith.constant 8.000000e+01 : f32
    %31 = vector.broadcast %cst_26 : f32 to vector<16x256xf32>
    %32 = arith.minimumf %30, %31 : vector<16x256xf32>
    %33 = math.exp %32 : vector<16x256xf32>
    %cst_27 = arith.constant 1.000000e+00 : f32
    %34 = vector.broadcast %cst_27 : f32 to vector<16x256xf32>
    %35 = arith.addf %34, %33 : vector<16x256xf32>
    %36 = tpu.reciprocal %35 {approx = true} : vector<16x256xf32> -> vector<16x256xf32>
    %37 = arith.mulf %28, %36 : vector<16x256xf32>
    %38 = arith.truncf %37 : vector<16x256xf32> to vector<16x256xbf16>
    %cst_28 = arith.constant 0.000000e+00 : f32
    %39 = vector.broadcast %cst_28 : f32 to vector<8x256xf32>
    %c0_29 = arith.constant 0 : index
    %c0_30 = arith.constant 0 : index
    %c0_31 = arith.constant 0 : index
    %40 = vector.load %arg5[%c0_29, %c0_30, %c0_31] : memref<3x8x16xbf16, #tpu.memory_space<vmem>>, vector<1x8x16xbf16>
    %41 = vector.shape_cast %40 : vector<1x8x16xbf16> to vector<8x16xbf16>
    %cst_32 = arith.constant dense<0.000000e+00> : vector<8x256xf32>
    %42 = tpu.matmul %41, %38, %cst_32 {dimension_numbers = #tpu.dot_dimension_numbers<[1], [0], [0], [1], [0, 0, 1, 1], [], []>} : vector<8x16xbf16>, vector<16x256xbf16>, vector<8x256xf32> -> vector<8x256xf32>
    %43 = arith.truncf %42 : vector<8x256xf32> to vector<8x256xbf16>
    %c0_33 = arith.constant 0 : index
    %c0_34 = arith.constant 0 : index
    %c0_35 = arith.constant 0 : index
    %44 = vector.load %arg6[%c0_33, %c0_34, %c0_35] : memref<3x256x256xbf16, #tpu.memory_space<vmem>>, vector<1x256x256xbf16>
    %45 = vector.shape_cast %44 : vector<1x256x256xbf16> to vector<256x256xbf16>
    %cst_36 = arith.constant dense<0.000000e+00> : vector<8x256xf32>
    %46 = tpu.matmul %43, %45, %cst_36 {dimension_numbers = #tpu.dot_dimension_numbers<[1], [0], [0], [1], [0, 0, 1, 1], [], []>} : vector<8x256xbf16>, vector<256x256xbf16>, vector<8x256xf32> -> vector<8x256xf32>
    %47 = arith.addf %39, %46 : vector<8x256xf32>
    %c1_37 = arith.constant 1 : index
    %c0_38 = arith.constant 0 : index
    %c0_39 = arith.constant 0 : index
    %48 = vector.load %arg5[%c1_37, %c0_38, %c0_39] : memref<3x8x16xbf16, #tpu.memory_space<vmem>>, vector<1x8x16xbf16>
    %49 = vector.shape_cast %48 : vector<1x8x16xbf16> to vector<8x16xbf16>
    %cst_40 = arith.constant dense<0.000000e+00> : vector<8x256xf32>
    %50 = tpu.matmul %49, %38, %cst_40 {dimension_numbers = #tpu.dot_dimension_numbers<[1], [0], [0], [1], [0, 0, 1, 1], [], []>} : vector<8x16xbf16>, vector<16x256xbf16>, vector<8x256xf32> -> vector<8x256xf32>
    %51 = arith.truncf %50 : vector<8x256xf32> to vector<8x256xbf16>
    %c1_41 = arith.constant 1 : index
    %c0_42 = arith.constant 0 : index
    %c0_43 = arith.constant 0 : index
    %52 = vector.load %arg6[%c1_41, %c0_42, %c0_43] : memref<3x256x256xbf16, #tpu.memory_space<vmem>>, vector<1x256x256xbf16>
    %53 = vector.shape_cast %52 : vector<1x256x256xbf16> to vector<256x256xbf16>
    %cst_44 = arith.constant dense<0.000000e+00> : vector<8x256xf32>
    %54 = tpu.matmul %51, %53, %cst_44 {dimension_numbers = #tpu.dot_dimension_numbers<[1], [0], [0], [1], [0, 0, 1, 1], [], []>} : vector<8x256xbf16>, vector<256x256xbf16>, vector<8x256xf32> -> vector<8x256xf32>
    %55 = arith.addf %47, %54 : vector<8x256xf32>
    %c2_45 = arith.constant 2 : index
    %c0_46 = arith.constant 0 : index
    %c0_47 = arith.constant 0 : index
    %56 = vector.load %arg5[%c2_45, %c0_46, %c0_47] : memref<3x8x16xbf16, #tpu.memory_space<vmem>>, vector<1x8x16xbf16>
    %57 = vector.shape_cast %56 : vector<1x8x16xbf16> to vector<8x16xbf16>
    %cst_48 = arith.constant dense<0.000000e+00> : vector<8x256xf32>
    %58 = tpu.matmul %57, %38, %cst_48 {dimension_numbers = #tpu.dot_dimension_numbers<[1], [0], [0], [1], [0, 0, 1, 1], [], []>} : vector<8x16xbf16>, vector<16x256xbf16>, vector<8x256xf32> -> vector<8x256xf32>
    %59 = arith.truncf %58 : vector<8x256xf32> to vector<8x256xbf16>
    %c2_49 = arith.constant 2 : index
    %c0_50 = arith.constant 0 : index
    %c0_51 = arith.constant 0 : index
    %60 = vector.load %arg6[%c2_49, %c0_50, %c0_51] : memref<3x256x256xbf16, #tpu.memory_space<vmem>>, vector<1x256x256xbf16>
    %61 = vector.shape_cast %60 : vector<1x256x256xbf16> to vector<256x256xbf16>
    %cst_52 = arith.constant dense<0.000000e+00> : vector<8x256xf32>
    %62 = tpu.matmul %59, %61, %cst_52 {dimension_numbers = #tpu.dot_dimension_numbers<[1], [0], [0], [1], [0, 0, 1, 1], [], []>} : vector<8x256xbf16>, vector<256x256xbf16>, vector<8x256xf32> -> vector<8x256xf32>
    %63 = arith.addf %55, %62 : vector<8x256xf32>
    %c0_53 = arith.constant 0 : index
    %c0_54 = arith.constant 0 : index
    %64 = vector.load %arg7[%c0_53, %c0_54] : memref<1x256xf32, #tpu.memory_space<vmem>>, vector<1x256xf32>
    %65 = vector.broadcast %64 : vector<1x256xf32> to vector<8x256xf32>
    %66 = arith.addf %63, %65 : vector<8x256xf32>
    %cst_55 = arith.constant 0.000000e+00 : f32
    %67 = vector.broadcast %cst_55 : f32 to vector<8x256xf32>
    %68 = arith.subf %67, %66 : vector<8x256xf32>
    %cst_56 = arith.constant 8.000000e+01 : f32
    %69 = vector.broadcast %cst_56 : f32 to vector<8x256xf32>
    %70 = arith.minimumf %68, %69 : vector<8x256xf32>
    %71 = math.exp %70 : vector<8x256xf32>
    %cst_57 = arith.constant 1.000000e+00 : f32
    %72 = vector.broadcast %cst_57 : f32 to vector<8x256xf32>
    %73 = arith.addf %72, %71 : vector<8x256xf32>
    %74 = tpu.reciprocal %73 {approx = true} : vector<8x256xf32> -> vector<8x256xf32>
    %75 = arith.mulf %66, %74 : vector<8x256xf32>
    %76 = arith.truncf %75 : vector<8x256xf32> to vector<8x256xbf16>
    %cst_58 = arith.constant 0.000000e+00 : f32
    %77 = vector.broadcast %cst_58 : f32 to vector<4x128xf32>
    %c0_59 = arith.constant 0 : index
    %c0_60 = arith.constant 0 : index
    %c0_61 = arith.constant 0 : index
    %78 = vector.load %arg8[%c0_59, %c0_60, %c0_61] : memref<3x4x8xbf16, #tpu.memory_space<vmem>>, vector<1x4x8xbf16>
    %79 = vector.shape_cast %78 : vector<1x4x8xbf16> to vector<4x8xbf16>
    %cst_62 = arith.constant dense<0.000000e+00> : vector<4x256xf32>
    %80 = tpu.matmul %79, %76, %cst_62 {dimension_numbers = #tpu.dot_dimension_numbers<[1], [0], [0], [1], [0, 0, 1, 1], [], []>} : vector<4x8xbf16>, vector<8x256xbf16>, vector<4x256xf32> -> vector<4x256xf32>
    %81 = arith.truncf %80 : vector<4x256xf32> to vector<4x256xbf16>
    %c0_63 = arith.constant 0 : index
    %c0_64 = arith.constant 0 : index
    %c0_65 = arith.constant 0 : index
    %82 = vector.load %arg9[%c0_63, %c0_64, %c0_65] : memref<3x256x128xbf16, #tpu.memory_space<vmem>>, vector<1x256x128xbf16>
    %83 = vector.shape_cast %82 : vector<1x256x128xbf16> to vector<256x128xbf16>
    %cst_66 = arith.constant dense<0.000000e+00> : vector<4x128xf32>
    %84 = tpu.matmul %81, %83, %cst_66 {dimension_numbers = #tpu.dot_dimension_numbers<[1], [0], [0], [1], [0, 0, 1, 1], [], []>} : vector<4x256xbf16>, vector<256x128xbf16>, vector<4x128xf32> -> vector<4x128xf32>
    %85 = arith.addf %77, %84 : vector<4x128xf32>
    %c1_67 = arith.constant 1 : index
    %c0_68 = arith.constant 0 : index
    %c0_69 = arith.constant 0 : index
    %86 = vector.load %arg8[%c1_67, %c0_68, %c0_69] : memref<3x4x8xbf16, #tpu.memory_space<vmem>>, vector<1x4x8xbf16>
    %87 = vector.shape_cast %86 : vector<1x4x8xbf16> to vector<4x8xbf16>
    %cst_70 = arith.constant dense<0.000000e+00> : vector<4x256xf32>
    %88 = tpu.matmul %87, %76, %cst_70 {dimension_numbers = #tpu.dot_dimension_numbers<[1], [0], [0], [1], [0, 0, 1, 1], [], []>} : vector<4x8xbf16>, vector<8x256xbf16>, vector<4x256xf32> -> vector<4x256xf32>
    %89 = arith.truncf %88 : vector<4x256xf32> to vector<4x256xbf16>
    %c1_71 = arith.constant 1 : index
    %c0_72 = arith.constant 0 : index
    %c0_73 = arith.constant 0 : index
    %90 = vector.load %arg9[%c1_71, %c0_72, %c0_73] : memref<3x256x128xbf16, #tpu.memory_space<vmem>>, vector<1x256x128xbf16>
    %91 = vector.shape_cast %90 : vector<1x256x128xbf16> to vector<256x128xbf16>
    %cst_74 = arith.constant dense<0.000000e+00> : vector<4x128xf32>
    %92 = tpu.matmul %89, %91, %cst_74 {dimension_numbers = #tpu.dot_dimension_numbers<[1], [0], [0], [1], [0, 0, 1, 1], [], []>} : vector<4x256xbf16>, vector<256x128xbf16>, vector<4x128xf32> -> vector<4x128xf32>
    %93 = arith.addf %85, %92 : vector<4x128xf32>
    %c2_75 = arith.constant 2 : index
    %c0_76 = arith.constant 0 : index
    %c0_77 = arith.constant 0 : index
    %94 = vector.load %arg8[%c2_75, %c0_76, %c0_77] : memref<3x4x8xbf16, #tpu.memory_space<vmem>>, vector<1x4x8xbf16>
    %95 = vector.shape_cast %94 : vector<1x4x8xbf16> to vector<4x8xbf16>
    %cst_78 = arith.constant dense<0.000000e+00> : vector<4x256xf32>
    %96 = tpu.matmul %95, %76, %cst_78 {dimension_numbers = #tpu.dot_dimension_numbers<[1], [0], [0], [1], [0, 0, 1, 1], [], []>} : vector<4x8xbf16>, vector<8x256xbf16>, vector<4x256xf32> -> vector<4x256xf32>
    %97 = arith.truncf %96 : vector<4x256xf32> to vector<4x256xbf16>
    %c2_79 = arith.constant 2 : index
    %c0_80 = arith.constant 0 : index
    %c0_81 = arith.constant 0 : index
    %98 = vector.load %arg9[%c2_79, %c0_80, %c0_81] : memref<3x256x128xbf16, #tpu.memory_space<vmem>>, vector<1x256x128xbf16>
    %99 = vector.shape_cast %98 : vector<1x256x128xbf16> to vector<256x128xbf16>
    %cst_82 = arith.constant dense<0.000000e+00> : vector<4x128xf32>
    %100 = tpu.matmul %97, %99, %cst_82 {dimension_numbers = #tpu.dot_dimension_numbers<[1], [0], [0], [1], [0, 0, 1, 1], [], []>} : vector<4x256xbf16>, vector<256x128xbf16>, vector<4x128xf32> -> vector<4x128xf32>
    %101 = arith.addf %93, %100 : vector<4x128xf32>
    %c0_83 = arith.constant 0 : index
    %c0_84 = arith.constant 0 : index
    %102 = vector.load %arg10[%c0_83, %c0_84] : memref<1x128xf32, #tpu.memory_space<vmem>>, vector<1x128xf32>
    %103 = vector.broadcast %102 : vector<1x128xf32> to vector<4x128xf32>
    %104 = arith.addf %101, %103 : vector<4x128xf32>
    %cst_85 = arith.constant 0.000000e+00 : f32
    %105 = vector.broadcast %cst_85 : f32 to vector<4x128xf32>
    %106 = arith.subf %105, %104 : vector<4x128xf32>
    %cst_86 = arith.constant 8.000000e+01 : f32
    %107 = vector.broadcast %cst_86 : f32 to vector<4x128xf32>
    %108 = arith.minimumf %106, %107 : vector<4x128xf32>
    %109 = math.exp %108 : vector<4x128xf32>
    %cst_87 = arith.constant 1.000000e+00 : f32
    %110 = vector.broadcast %cst_87 : f32 to vector<4x128xf32>
    %111 = arith.addf %110, %109 : vector<4x128xf32>
    %112 = tpu.reciprocal %111 {approx = true} : vector<4x128xf32> -> vector<4x128xf32>
    %113 = arith.mulf %104, %112 : vector<4x128xf32>
    %114 = arith.truncf %113 : vector<4x128xf32> to vector<4x128xbf16>
    %cst_88 = arith.constant 0.000000e+00 : f32
    %115 = vector.broadcast %cst_88 : f32 to vector<2x128xf32>
    %116 = vector.extract_strided_slice %114 {offsets = [0, 0], sizes = [2, 128], strides = [1, 1]} : vector<4x128xbf16> to vector<2x128xbf16>
    %c0_89 = arith.constant 0 : index
    %c0_90 = arith.constant 0 : index
    %c0_91 = arith.constant 0 : index
    %117 = vector.load %arg11[%c0_89, %c0_90, %c0_91] : memref<2x128x128xbf16, #tpu.memory_space<vmem>>, vector<1x128x128xbf16>
    %118 = vector.shape_cast %117 : vector<1x128x128xbf16> to vector<128x128xbf16>
    %cst_92 = arith.constant dense<0.000000e+00> : vector<2x128xf32>
    %119 = tpu.matmul %116, %118, %cst_92 {dimension_numbers = #tpu.dot_dimension_numbers<[1], [0], [0], [1], [0, 0, 1, 1], [], []>} : vector<2x128xbf16>, vector<128x128xbf16>, vector<2x128xf32> -> vector<2x128xf32>
    %120 = arith.addf %115, %119 : vector<2x128xf32>
    %121 = vector.extract_strided_slice %114 {offsets = [2, 0], sizes = [2, 128], strides = [1, 1]} : vector<4x128xbf16> to vector<2x128xbf16>
    %c1_93 = arith.constant 1 : index
    %c0_94 = arith.constant 0 : index
    %c0_95 = arith.constant 0 : index
    %122 = vector.load %arg11[%c1_93, %c0_94, %c0_95] : memref<2x128x128xbf16, #tpu.memory_space<vmem>>, vector<1x128x128xbf16>
    %123 = vector.shape_cast %122 : vector<1x128x128xbf16> to vector<128x128xbf16>
    %cst_96 = arith.constant dense<0.000000e+00> : vector<2x128xf32>
    %124 = tpu.matmul %121, %123, %cst_96 {dimension_numbers = #tpu.dot_dimension_numbers<[1], [0], [0], [1], [0, 0, 1, 1], [], []>} : vector<2x128xbf16>, vector<128x128xbf16>, vector<2x128xf32> -> vector<2x128xf32>
    %125 = arith.addf %120, %124 : vector<2x128xf32>
    %c0_97 = arith.constant 0 : index
    %c0_98 = arith.constant 0 : index
    %126 = vector.load %arg12[%c0_97, %c0_98] : memref<1x128xf32, #tpu.memory_space<vmem>>, vector<1x128xf32>
    %127 = vector.broadcast %126 : vector<1x128xf32> to vector<2x128xf32>
    %128 = arith.addf %125, %127 : vector<2x128xf32>
    %c0_99 = arith.constant 0 : index
    %c0_100 = arith.constant 0 : index
    %129 = vector.load %arg13[%c0_99, %c0_100] : memref<2x128xf32, #tpu.memory_space<vmem>>, vector<2x128xf32>
    tpu.vector_store %arg13[%c0_99, %c0_100], %128 {strides = array<i32>} : memref<2x128xf32, #tpu.memory_space<vmem>>, vector<2x128xf32>,
    return
  }
  func.func @transform_0(%arg0: i32) -> (i32, i32) {
    %c0_i32 = arith.constant 0 : i32
    %c0_i32_0 = arith.constant 0 : i32
    return %arg0, %c0_i32 : i32, i32
  }
  func.func @transform_1(%arg0: i32) -> (i32, i32, i32) {
    %c0_i32 = arith.constant 0 : i32
    %c0_i32_0 = arith.constant 0 : i32
    %c0_i32_1 = arith.constant 0 : i32
    %c0_i32_2 = arith.constant 0 : i32
    return %c0_i32, %c0_i32_0, %c0_i32_1 : i32, i32, i32
  }
  func.func @transform_2(%arg0: i32) -> (i32, i32, i32) {
    %c0_i32 = arith.constant 0 : i32
    %c0_i32_0 = arith.constant 0 : i32
    %c0_i32_1 = arith.constant 0 : i32
    %c0_i32_2 = arith.constant 0 : i32
    return %c0_i32, %c0_i32_0, %c0_i32_1 : i32, i32, i32
  }
  func.func @transform_3(%arg0: i32) -> (i32, i32) {
    %c0_i32 = arith.constant 0 : i32
    %c0_i32_0 = arith.constant 0 : i32
    %c0_i32_1 = arith.constant 0 : i32
    return %c0_i32, %c0_i32_0 : i32, i32
  }
  func.func @transform_4(%arg0: i32) -> (i32, i32, i32) {
    %c0_i32 = arith.constant 0 : i32
    %c0_i32_0 = arith.constant 0 : i32
    %c0_i32_1 = arith.constant 0 : i32
    %c0_i32_2 = arith.constant 0 : i32
    return %c0_i32, %c0_i32_0, %c0_i32_1 : i32, i32, i32
  }
  func.func @transform_5(%arg0: i32) -> (i32, i32, i32) {
    %c0_i32 = arith.constant 0 : i32
    %c0_i32_0 = arith.constant 0 : i32
    %c0_i32_1 = arith.constant 0 : i32
    %c0_i32_2 = arith.constant 0 : i32
    return %c0_i32, %c0_i32_0, %c0_i32_1 : i32, i32, i32
  }
  func.func @transform_6(%arg0: i32) -> (i32, i32) {
    %c0_i32 = arith.constant 0 : i32
    %c0_i32_0 = arith.constant 0 : i32
    %c0_i32_1 = arith.constant 0 : i32
    return %c0_i32, %c0_i32_0 : i32, i32
  }
  func.func @transform_7(%arg0: i32) -> (i32, i32, i32) {
    %c0_i32 = arith.constant 0 : i32
    %c0_i32_0 = arith.constant 0 : i32
    %c0_i32_1 = arith.constant 0 : i32
    %c0_i32_2 = arith.constant 0 : i32
    return %c0_i32, %c0_i32_0, %c0_i32_1 : i32, i32, i32
  }
  func.func @transform_8(%arg0: i32) -> (i32, i32, i32) {
    %c0_i32 = arith.constant 0 : i32
    %c0_i32_0 = arith.constant 0 : i32
    %c0_i32_1 = arith.constant 0 : i32
    %c0_i32_2 = arith.constant 0 : i32
    return %c0_i32, %c0_i32_0, %c0_i32_1 : i32, i32, i32
  }
  func.func @transform_9(%arg0: i32) -> (i32, i32) {
    %c0_i32 = arith.constant 0 : i32
    %c0_i32_0 = arith.constant 0 : i32
    %c0_i32_1 = arith.constant 0 : i32
    return %c0_i32, %c0_i32_0 : i32, i32
  }
  func.func @transform_10(%arg0: i32) -> (i32, i32, i32) {
    %c0_i32 = arith.constant 0 : i32
    %c0_i32_0 = arith.constant 0 : i32
    %c0_i32_1 = arith.constant 0 : i32
    %c0_i32_2 = arith.constant 0 : i32
    return %c0_i32, %c0_i32_0, %c0_i32_1 : i32, i32, i32
  }
  func.func @transform_11(%arg0: i32) -> (i32, i32) {
    %c0_i32 = arith.constant 0 : i32
    %c0_i32_0 = arith.constant 0 : i32
    %c0_i32_1 = arith.constant 0 : i32
    return %c0_i32, %c0_i32_0 : i32, i32
  }
  func.func @transform_12(%arg0: i32) -> (i32, i32) {
    %c0_i32 = arith.constant 0 : i32
    %c0_i32_0 = arith.constant 0 : i32
    return %arg0, %c0_i32 : i32, i32
  }
}

</mosaic_0001>

<bundles_post_ra>
// kernel: model_features_forward.1
= control target key start
LH: loop header
LB: loop body
LE: loop exit
PB: predicated region body
PF: predicated region fallthrough
CT: control target
= control target key end

     0   :  { %17 = vsyncpa [#allocation3], 0  ;;  %s3557_s0 = inlined_call_operand.vmem [shape: bf16[32,64], index: 0, kind: input, shape index: {}]   ;;  %s3558_s1 = inlined_call_operand.vmem [shape: bf16[3,16,32], index: 1, kind: input, shape index: {}]   ;;  %s3559_s2 = inlined_call_operand.hbm [shape: bf16[3,64,256], index: 2, kind: input, shape index: {}]   ;;  %s3560_s3 = inlined_call_operand.vmem [shape: f32[1,256], index: 3, kind: input, shape index: {}]   ;;  %s3561_s4 = inlined_call_operand.vmem [shape: bf16[3,8,16], index: 4, kind: input, shape index: {}]   ;;  %s3562_s5 = inlined_call_operand.hbm [shape: bf16[3,256,256], index: 5, kind: input, shape index: {}]   ;;  %s3563_s6 = inlined_call_operand.vmem [shape: f32[1,256], index: 6, kind: input, shape index: {}]   ;;  %s3564_s7 = inlined_call_operand.vmem [shape: bf16[3,4,8], index: 7, kind: input, shape index: {}]   ;;  %s3565_s8 = inlined_call_operand.vmem [shape: bf16[3,256,128], index: 8, kind: input, shape index: {}]   ;;  %s3566_s9 = inlined_call_operand.vmem [shape: f32[1,128], index: 9, kind: input, shape index: {}]   ;;  %s3567_s10 = inlined_call_operand.hbm [shape: bf16[2,128,128], index: 10, kind: input, shape index: {}]   ;;  %s3568_s11 = inlined_call_operand.vmem [shape: f32[1,128], index: 11, kind: input, shape index: {}]   ;;  %s3569_s12 = inlined_call_operand.hbm [shape: f32[2,128], index: 12, kind: output, shape index: {}]  }
   0x1   :  { %18 = vsyncpa [#allocation6], 0 }
   0x2   :  { %19 = vsyncpa [#allocation4], 0  ;;  %s3191_s21 = smov [#allocation5]   ;;  %s3192_s23 = smov [#allocation2]  }
   0x3   :  { %s45_s22 = sshll.u32 %s3191_s21, 4  ;;  %s29_s24 = sshll.u32 %s3192_s23, 4  ;;  %s46_s22 = int_to_ptr.vmem [resolvable:$true] %s45_s22  ;;  %s30_s24 = int_to_ptr.vmem [resolvable:$true] %s29_s24 }
   0x4   :  { %s3113_s25 = scalar_lea.vmem %s46_s22, 12288  ;;  %p3118_p1 = scmp.lt.s32.totalorder %s46_s22, %s46_s22 }
   0x5   :  { %p3114_p0 = scmp.ne.s32.totalorder %s46_s22, %s3113_s25  ;;  %p3119_p2 = scmp.lt.s32.totalorder %s3113_s25, %s3113_s25 }
   0x7   :  { %p3120_p3 = por %p3119_p2, %p3118_p1 }
   0x9   :  { %p3121_p4 = pnand %p3120_p3, %p3114_p0 }
   0xb   :  { %3124 = shalt.err (!%p3121_p4)
}
   0xc   :  { %s3193_s26 = smov 128   ;;  %s3194_s27 = smov 8  }
   0xd   :  { %51 = dma.hbm_to_vmem [thread:$0]  %s3562_s5, 12288, %s46_s22, [#allocation6], %s3193_s26, %s3193_s26, %s3194_s27  }
   0xe   :  { %s3133_s30 = scalar_lea.vmem %s30_s24, 3072  ;;  %p3138_p6 = scmp.lt.s32.totalorder %s30_s24, %s30_s24 }
   0xf   :  { %p3134_p5 = scmp.ne.s32.totalorder %s30_s24, %s3133_s30  ;;  %p3139_p7 = scmp.lt.s32.totalorder %s3133_s30, %s3133_s30 }
  0x11   :  { %p3140_p8 = por %p3139_p7, %p3138_p6 }
  0x13   :  { %p3141_p9 = pnand %p3140_p8, %p3134_p5 }
  0x15   :  { %3144 = shalt.err (!%p3141_p9)
}
  0x16   :  { %35 = dma.hbm_to_vmem [thread:$0]  %s3559_s2, 3072, %s30_s24, [#allocation3], %s3193_s26, %s3193_s26, %s3194_s27  }
  0x17   :  { %s3195_s15 = smov [#allocation7]  }
  0x18   :  { %s65_s16 = sshll.u32 %s3195_s15, 4  ;;  %s66_s16 = int_to_ptr.vmem [resolvable:$true] %s65_s16 }
  0x19   :  { %s3153_s17 = scalar_lea.vmem %s66_s16, 2048  ;;  %p3158_p11 = scmp.lt.s32.totalorder %s66_s16, %s66_s16 }
  0x1a   :  { %p3154_p10 = scmp.ne.s32.totalorder %s66_s16, %s3153_s17  ;;  %p3159_p12 = scmp.lt.s32.totalorder %s3153_s17, %s3153_s17 }
  0x1c   :  { %p3160_p13 = por %p3159_p12, %p3158_p11 }
  0x1e   :  { %p3161_p0 = pnand %p3160_p13, %p3154_p10 }
  0x20   :  { %3164 = shalt.err (!%p3161_p0)
}
  0x21   :  { %s3196_s5 = smov 64   ;;  %s3197_s18 = smov 4  }
  0x22   :  { %71 = dma.hbm_to_vmem [thread:$0]  %s3567_s10, 2048, %s66_s16, [#allocation6], %s3196_s5, %s3196_s5, %s3197_s18  }
  0x23   :  { %3185 = dma.done.wait [#allocation3], 3072  }
  0x24   :  { %3186 = vsyncadd [#allocation3], 4294964224 }
  0x25   :  { %3187 = dma.done.wait [#allocation6], 14336  }
  0x26   :  { %3188 = vsyncadd [#allocation6], 4294952960  ;;  %v3198_v0 = vmov 0.0   ;;  %vm3199_vm0 = vmmov 0   ;;  %v3282_v1 = vld [vmem:[%s3557_s0 + $0x8] sm:$0xff]   ;;  %v3288_v2 = vld [vmem:[%s3557_s0] sm:$0xff]  }
  0x27   :  { %2753 = vmatprep.subr.bf16.mxu1 %v3198_v0  ;;  %2757 = vmatprep.mubr.msk.bf16.mxu1 %vm3199_vm0, %v3198_v0  ;;  %v2830_v3 = vld [vmem:[%s3558_s1] sm:$0xff]   ;;  %vm107_vm1 = vcmask 261120   ;;  %v2838_v4 = vld [vmem:[#allocation2 + $0x74] ss:$8 sps:$4 sm:$0xff]   ;;  %v2831_v6 = vld [vmem:[%s3558_s1 + $0x8] sm:$0xff]   ;;  %v3200_v18 = vmov 0  }
  0x28   :  { %2754 = vmatpush3.bf16.msra.mxu1 %v3282_v1  ;;  %v2834_v5 = vld [vmem:[#allocation2 + $0x34] ss:$8 sps:$4 sm:$0xff]   ;;  %275 = vmatprep.subr.bf16.mxu0 %v2838_v4  ;;  %v2832_v7 = vld [vmem:[#allocation2 + $0x30] ss:$8 sps:$4 sm:$0xff]   ;;  %v2837_v8 = vld [vmem:[#allocation2 + $0x24] ss:$8 sps:$4 sm:$0xff]  }
  0x29   :  { %2755 = vmatprep.subr.bf16.mxu1 %v3198_v0  ;;  %v2835_v9 = vld [vmem:[#allocation2 + $0x20] ss:$8 sps:$4 sm:$0xff]   ;;  %v2842_v10 = vld [vmem:[#allocation2 + $0x14] ss:$8 sps:$4 sm:$0xff]   ;;  %v2840_v11 = vld [vmem:[#allocation2 + $0x10] ss:$8 sps:$4 sm:$0xff]   ;;  %299 = vmatprep.mubr.bf16.mxu0 %v3200_v18 }
  0x2a   :  { %v2843_v12 = vld [vmem:[#allocation2 + $0x70] ss:$8 sps:$4 sm:$0xff]   ;;  %v2844_v13 = vld [vmem:[#allocation2 + $0x64] ss:$8 sps:$4 sm:$0xff]   ;;  %v2846_v15 = vld [vmem:[#allocation2] ss:$8 sps:$4 sm:$0xff]  }
  0x2b   :  { %276 = vmatpush1.bf16.msra.mxu0 %v2843_v12  ;;  %v2848_v14 = vld [vmem:[#allocation2 + $0x4] ss:$8 sps:$4 sm:$0xff]   ;;  %v2849_v16 = vld [vmem:[#allocation2 + $0x60] ss:$8 sps:$4 sm:$0xff]   ;;  %v2850_v17 = vld [vmem:[#allocation2 + $0x54] ss:$8 sps:$4 sm:$0xff]  }
  0x2c   :  { %2756 = vmatpush3.bf16.msra.mxu1 %v3288_v2  ;;  %277 = vmatprep.subr.bf16.mxu0 %v2844_v13  ;;  %v2852_v19 = vld [vmem:[#allocation2 + $0x50] ss:$8 sps:$4 sm:$0xff]   ;;  %v2853_v20 = vld [vmem:[#allocation2 + $0x44] ss:$8 sps:$4 sm:$0xff]   ;;  %v2855_v21 = vld [vmem:[#allocation2 + $0x40] ss:$8 sps:$4 sm:$0xff]  }
  0x2d   :  { %2761 = vmatprep.subr.bf16.mxu1 %v3198_v0  ;;  %vm263_vm2 = vcmask 523264   ;;  %v2856_v32 = vld [vmem:[%s3558_s1 + $0x10] sm:$0xff]   ;;  %v2862_v35 = vld [vmem:[#allocation2 + $0xa4] ss:$8 sps:$4 sm:$0xff]   ;;  %v2860_v36 = vld [vmem:[#allocation2 + $0xa0] ss:$8 sps:$4 sm:$0xff]  }
  0x2e   :  { %v2859_v33 = vld [vmem:[#allocation2 + $0xb4] ss:$8 sps:$4 sm:$0xff]   ;;  %v2857_v34 = vld [vmem:[#allocation2 + $0xb0] ss:$8 sps:$4 sm:$0xff]   ;;  %v2868_v39 = vld [vmem:[#allocation2 + $0x84] ss:$8 sps:$4 sm:$0xff]  }
  0x2f   :  { %2758 = vmatmul.mubr.msk.bf16.vlgmr.msra.gmra.mxu1 %vm107_vm1, %v2830_v3  ;;  %278 = vmatpush1.bf16.msra.mxu0 %v2849_v16  ;;  %v2865_v37 = vld [vmem:[#allocation2 + $0x94] ss:$8 sps:$4 sm:$0xff]   ;;  %v2863_v38 = vld [vmem:[#allocation2 + $0x90] ss:$8 sps:$4 sm:$0xff]   ;;  %v2866_v40 = vld [vmem:[#allocation2 + $0x80] ss:$8 sps:$4 sm:$0xff]  }
  0x30   :  { %2762 = vmatpush3.bf16.msra.mxu1 %v3282_v1  ;;  %2765 = vmatprep.mubr.msk.bf16.mxu1 %vm3199_vm0, %v3198_v0  ;;  %v2871_v41 = vld [vmem:[#allocation5 + $0x174] ss:$8 sps:$4 sm:$0xff]   ;;  %v2869_v49 = vld [vmem:[#allocation5 + $0x170] ss:$8 sps:$4 sm:$0xff]   ;;  %v2874_v51 = vld [vmem:[#allocation5 + $0x164] ss:$8 sps:$4 sm:$0xff]  }
  0x31   :  { %2763 = vmatprep.subr.bf16.mxu1 %v3198_v0  ;;  %279 = vmatprep.subr.bf16.mxu0 %v2850_v17  ;;  %v2872_v53 = vld [vmem:[#allocation5 + $0x160] ss:$8 sps:$4 sm:$0xff]   ;;  %v2877_v54 = vld [vmem:[#allocation5 + $0x154] ss:$8 sps:$4 sm:$0xff]   ;;  %v2875_v55 = vld [vmem:[#allocation5 + $0x150] ss:$8 sps:$4 sm:$0xff]  }
  0x32   :  { %v2880_v56 = vld [vmem:[#allocation5 + $0x144] ss:$8 sps:$4 sm:$0xff]   ;;  %v2878_v57 = vld [vmem:[#allocation5 + $0x140] ss:$8 sps:$4 sm:$0xff]   ;;  %v2883_v58 = vld [vmem:[#allocation5 + $0x134] ss:$8 sps:$4 sm:$0xff]  }
  0x33   :  { %280 = vmatpush1.bf16.msra.mxu0 %v2852_v19  ;;  %v2881_v59 = vld [vmem:[#allocation5 + $0x130] ss:$8 sps:$4 sm:$0xff]   ;;  %v2886_v60 = vld [vmem:[#allocation5 + $0x124] ss:$8 sps:$4 sm:$0xff]   ;;  %v2884_v61 = vld [vmem:[#allocation5 + $0x120] ss:$8 sps:$4 sm:$0xff]  }
  0x34   :  { %2764 = vmatpush3.bf16.msra.mxu1 %v3288_v2  ;;  %281 = vmatprep.subr.bf16.mxu0 %v2853_v20  ;;  %v2889_v62 = vld [vmem:[#allocation5 + $0x114] ss:$8 sps:$4 sm:$0xff]   ;;  %v2887_v63 = vld [vmem:[#allocation5 + $0x110] ss:$8 sps:$4 sm:$0xff]   ;;  %v2910_v13 = vld [vmem:[#allocation5 + $0x1a4] ss:$8 sps:$4 sm:$0xff]  }
  0x35   :  { %361 = vmatprep.subr.bf16.mxu1 %v2834_v5  ;;  %v2895_v3 = vld [vmem:[#allocation5 + $0x1f4] ss:$8 sps:$4 sm:$0xff]   ;;  %v2893_v4 = vld [vmem:[#allocation5 + $0x1f0] ss:$8 sps:$4 sm:$0xff]   ;;  %v2898_v5 = vld [vmem:[#allocation5 + $0x1e4] ss:$8 sps:$4 sm:$0xff]  }
  0x36   :  { %v2905_v12 = vld [vmem:[#allocation5 + $0x1b0] ss:$8 sps:$4 sm:$0xff]   ;;  %v2914_v17 = vld [vmem:[#allocation5 + $0x180] ss:$8 sps:$4 sm:$0xff]   ;;  %v2916_v19 = vld [vmem:[#allocation5 + $0x184] ss:$8 sps:$4 sm:$0xff]  }
  0x37   :  { %2766 = vmatmul.mubr.msk.bf16.vlgmr.msra.gmra.mxu1 %vm107_vm1, %v2831_v6  ;;  %282 = vmatpush1.bf16.msra.mxu0 %v2855_v21  ;;  %v2896_v6 = vld [vmem:[#allocation5 + $0x1e0] ss:$8 sps:$4 sm:$0xff]   ;;  %v2911_v16 = vld [vmem:[#allocation5 + $0x190] ss:$8 sps:$4 sm:$0xff]   ;;  %v550_v21 = vlaneseq  ;;  %vm595_vm3 = vcmask 130048   ;;  %vm1476_vm4 = vcmask 1043456  }
  0x38   :  { %362 = vmatpush1.bf16.msra.mxu1 %v2832_v7  ;;  %385 = vmatprep.mubr.bf16.mxu1 %v3200_v18  ;;  %v2901_v7 = vld [vmem:[#allocation5 + $0x1d4] ss:$8 sps:$4 sm:$0xff]   ;;  %vm1472_vm5 = vcmask 64512   ;;  %s3201_s14 = smov [#allocation8]  }
  0x39   :  { %363 = vmatprep.subr.bf16.mxu1 %v2837_v8  ;;  %2769 = vmatprep.subr.bf16.mxu0 %v3198_v0  ;;  %v2899_v8 = vld [vmem:[#allocation5 + $0x1d0] ss:$8 sps:$4 sm:$0xff]   ;;  %s2372_s15 = sshll.u32 %s3201_s14, 4  ;;  %s2373_s15 = int_to_ptr.vmem [resolvable:$true] %s2372_s15 }
  0x3a   :  { %p3170_p2 = scmp.lt.s32.totalorder %s2373_s15, %s2373_s15 }
  0x3c   :  { %364 = vmatpush1.bf16.msra.mxu1 %v2835_v9  ;;  %v2904_v9 = vld [vmem:[#allocation5 + $0x1c4] ss:$8 sps:$4 sm:$0xff]  }
  0x3d   :  { %365 = vmatprep.subr.bf16.mxu1 %v2842_v10  ;;  %v2902_v10 = vld [vmem:[#allocation5 + $0x1c0] ss:$8 sps:$4 sm:$0xff]  }
  0x40   :  { %366 = vmatpush1.bf16.msra.mxu1 %v2840_v11  ;;  %v2907_v11 = vld [vmem:[#allocation5 + $0x1b4] ss:$8 sps:$4 sm:$0xff]  }
  0x41   :  { %367 = vmatprep.subr.bf16.mxu1 %v2848_v14  ;;  %v2908_v14 = vld [vmem:[#allocation5 + $0x1a0] ss:$8 sps:$4 sm:$0xff]  }
  0x44   :  { %368 = vmatpush1.bf16.msra.mxu1 %v2846_v15  ;;  %v2913_v15 = vld [vmem:[#allocation5 + $0x194] ss:$8 sps:$4 sm:$0xff]  }
  0x45   :  { %509 = vmatprep.subr.bf16.mxu1 %v2859_v33 }
  0xef   :  { %v145_v22 = vpop.f32.mrf.mxu1 }
  0xf1   :  { %v2759_v23 = vpop.f32.mrf.mxu1 }
  0xf2   :  { %v3331_v23 = vshrl.u32 %v550_v21, 7  ;;  %v2925_v21 = vld [vmem:[#allocation5 + $0x54] ss:$8 sps:$4 sm:$0xff]  }
  0xf3   :  { %v148_v24 = vpop.f32.mrf.mxu1 }
  0xf4   :  { %v152_v25 = vpack.c.bf16 %v148_v24, %v145_v22 }
  0xf5   :  { %v2760_v26 = vpop.f32.mrf.mxu1 }
  0xf6   :  { %2407 = vmatmul.mubr.msk.bf16.vlgmr.msra.gmra.mxu1 %vm263_vm2, %v152_v25  ;;  %v552_v25 = vsub.s32 0, %v3331_v23  ;;  %v548_v26 = vld [vmem:[%s3560_s3] sm:$0x3] }
  0xf7   :  { %v206_v27 = vpop.f32.mrf.mxu1  ;;  %533 = vmatprep.mubr.bf16.mxu1 %v3200_v18  ;;  %510 = vmatpush1.bf16.msra.mxu1 %v2857_v34 }
  0xf8   :  { %511 = vmatprep.subr.bf16.mxu1 %v2862_v35 }
  0xf9   :  { %v2767_v28 = vpop.f32.mrf.mxu1 }
  0xfb   :  { %v209_v29 = vpop.f32.mrf.mxu1  ;;  %512 = vmatpush1.bf16.msra.mxu1 %v2860_v36 }
  0xfc   :  { %v213_v30 = vpack.c.bf16 %v209_v29, %v206_v27  ;;  %513 = vmatprep.subr.bf16.mxu1 %v2865_v37  ;;  %v556_v27 = vsub.s32 1, %v3331_v23 }
  0xfd   :  { %v2768_v31 = vpop.f32.mrf.mxu1 }
  0xfe   :  { %2398 = vmatmul.mubr.msk.bf16.vlgmr.msra.gmra.mxu0 %vm263_vm2, %v213_v30  ;;  %v553_v30 = vrot.slane %v548_v26, %v552_v25  ;;  %v557_v34 = vrot.slane %v548_v26, %v556_v27  ;;  %v2926_v26 = vld [vmem:[#allocation5 + $0x40] ss:$8 sps:$4 sm:$0xff]  }
  0xff   :  { %2770 = vmatpush3.bf16.msra.mxu0 %v3282_v1  ;;  %2773 = vmatprep.mubr.msk.bf16.mxu0 %vm3199_vm0, %v3198_v0  ;;  %v2892_v1 = vld [vmem:[#allocation5 + $0x104] ss:$8 sps:$4 sm:$0xff]  }
 0x100   :  { %2771 = vmatprep.subr.bf16.mxu0 %v3198_v0  ;;  %514 = vmatpush1.bf16.msra.mxu1 %v2863_v38 }
 0x101   :  { %515 = vmatprep.subr.bf16.mxu1 %v2868_v39 }
 0x103   :  { %2772 = vmatpush3.bf16.msra.mxu0 %v3288_v2  ;;  %v2890_v2 = vld [vmem:[#allocation5 + $0x100] ss:$8 sps:$4 sm:$0xff]  }
 0x104   :  { %516 = vmatpush1.bf16.msra.mxu1 %v2866_v40 }
 0x105   :  { %915 = vmatprep.subr.bf16.mxu1 %v2871_v41 }
 0x106   :  { %2774 = vmatmul.mubr.msk.bf16.vlgmr.msra.gmra.mxu0 %vm107_vm1, %v2856_v32 }
 0x107   :  { %631 = vmatprep.mubr.bf16.mxu0 %v3200_v18 }
 0x1b6   :  { %v387_v20 = vpop.f32.mrf.mxu1 }
 0x1b8   :  { %v389_v22 = vpop.f32.mrf.mxu1 }
 0x1ba   :  { %v391_v24 = vpop.f32.mrf.mxu1 }
 0x1bc   :  { %v393_v28 = vpop.f32.mrf.mxu1 }
 0x1be   :  { %v3322_v42 = vpop.f32.mrf.mxu0 }
 0x1bf   :  { %v388_v29 = vadd.f32 %v387_v20, %v3322_v42  ;;  %v2920_v20 = vld [vmem:[#allocation5 + $0x60] ss:$8 sps:$4 sm:$0xff]  }
 0x1c0   :  { %v3324_v43 = vpop.f32.mrf.mxu0 }
 0x1c1   :  { %v390_v32 = vadd.f32 %v389_v22, %v3324_v43  ;;  %v2923_v22 = vld [vmem:[#allocation5 + $0x50] ss:$8 sps:$4 sm:$0xff]  }
 0x1c2   :  { %v3326_v44 = vpop.f32.mrf.mxu0 }
 0x1c3   :  { %v392_v36 = vadd.f32 %v391_v24, %v3326_v44  ;;  %v2928_v24 = vld [vmem:[#allocation5 + $0x44] ss:$8 sps:$4 sm:$0xff]  }
 0x1c4   :  { %v3328_v45 = vpop.f32.mrf.mxu0 }
 0x1c5   :  { %v394_v40 = vadd.f32 %v393_v28, %v3328_v45  ;;  %v2931_v28 = vld [vmem:[#allocation5 + $0x34] ss:$8 sps:$4 sm:$0xff]  }
 0x1c6   :  { %v441_v46 = vpop.f32.mrf.mxu0 }
 0x1c8   :  { %v2775_v47 = vpop.f32.mrf.mxu0 }
 0x1ca   :  { %v444_v48 = vpop.f32.mrf.mxu0 }
 0x1cb   :  { %v448_v50 = vpack.c.bf16 %v444_v48, %v441_v46 }
 0x1cc   :  { %v2776_v52 = vpop.f32.mrf.mxu0 }
 0x1cd   :  { %2420 = vmatmul.mubr.msk.bf16.vlgmr.msra.gmra.mxu1 %vm263_vm2, %v448_v50 }
 0x1ce   :  { %916 = vmatpush1.bf16.msra.mxu1 %v2869_v49 }
 0x1cf   :  { %917 = vmatprep.subr.bf16.mxu1 %v2874_v51 }
 0x1d2   :  { %918 = vmatpush1.bf16.msra.mxu1 %v2872_v53 }
 0x1d3   :  { %919 = vmatprep.subr.bf16.mxu1 %v2877_v54 }
 0x1d6   :  { %920 = vmatpush1.bf16.msra.mxu1 %v2875_v55 }
 0x1d7   :  { %921 = vmatprep.subr.bf16.mxu1 %v2880_v56 }
 0x1da   :  { %922 = vmatpush1.bf16.msra.mxu1 %v2878_v57 }
 0x1db   :  { %923 = vmatprep.subr.bf16.mxu1 %v2883_v58 }
 0x1de   :  { %924 = vmatpush1.bf16.msra.mxu1 %v2881_v59 }
 0x1df   :  { %925 = vmatprep.subr.bf16.mxu1 %v2886_v60 }
 0x1e2   :  { %926 = vmatpush1.bf16.msra.mxu1 %v2884_v61 }
 0x1e3   :  { %927 = vmatprep.subr.bf16.mxu1 %v2889_v62 }
 0x1e6   :  { %928 = vmatpush1.bf16.msra.mxu1 %v2887_v63 }
 0x1e7   :  { %929 = vmatprep.subr.bf16.mxu1 %v2892_v1 }
 0x1ea   :  { %930 = vmatpush1.bf16.msra.mxu1 %v2890_v2 }
 0x1eb   :  { %931 = vmatprep.subr.bf16.mxu1 %v2895_v3 }
 0x1ee   :  { %932 = vmatpush2.bf16.msra.mxu1 %v2893_v4 }
 0x1ef   :  { %933 = vmatprep.subr.bf16.mxu1 %v2898_v5 }
 0x1f2   :  { %934 = vmatpush2.bf16.msra.mxu1 %v2896_v6 }
 0x1f3   :  { %935 = vmatprep.subr.bf16.mxu1 %v2901_v7 }
 0x1f6   :  { %936 = vmatpush2.bf16.msra.mxu1 %v2899_v8 }
 0x1f7   :  { %937 = vmatprep.subr.bf16.mxu1 %v2904_v9 }
 0x1fa   :  { %938 = vmatpush2.bf16.msra.mxu1 %v2902_v10 }
 0x1fb   :  { %939 = vmatprep.subr.bf16.mxu1 %v2907_v11 }
 0x1fe   :  { %940 = vmatpush2.bf16.msra.mxu1 %v2905_v12 }
 0x1ff   :  { %941 = vmatprep.subr.bf16.mxu1 %v2910_v13 }
 0x202   :  { %942 = vmatpush2.bf16.msra.mxu1 %v2908_v14  ;;  %v594_v14 = vld [vmem:[%s3561_s4] sm:$0xf] }
 0x203   :  { %943 = vmatprep.subr.bf16.mxu1 %v2913_v15  ;;  %v2919_v15 = vld [vmem:[#allocation5 + $0x74] ss:$8 sps:$4 sm:$0xff]  }
 0x206   :  { %944 = vmatpush2.bf16.msra.mxu1 %v2911_v16  ;;  %v2422_v16 = vld [vmem:[%s3561_s4 + $0x4] sm:$0xf] }
 0x207   :  { %945 = vmatprep.subr.bf16.mxu1 %v2916_v19  ;;  %v2922_v19 = vld [vmem:[#allocation5 + $0x64] ss:$8 sps:$4 sm:$0xff]  }
 0x20a   :  { %946 = vmatpush2.bf16.msra.mxu1 %v2914_v17  ;;  %v2917_v17 = vld [vmem:[#allocation5 + $0x70] ss:$8 sps:$4 sm:$0xff]  }
 0x28d   :  { %v535_v31 = vpop.f32.mrf.mxu1 }
 0x28e   :  { %v544_v33 = vadd.f32 %v535_v31, %v388_v29  ;;  %v2929_v29 = vld [vmem:[#allocation5 + $0x30] ss:$8 sps:$4 sm:$0xff]   ;;  %v2932_v31 = vld [vmem:[#allocation5 + $0x20] ss:$8 sps:$4 sm:$0xff]  }
 0x28f   :  { %v537_v35 = vpop.f32.mrf.mxu1 }
 0x290   :  { %v560_v37 = vadd.f32 %v553_v30, %v544_v33  ;;  %v545_v38 = vadd.f32 %v537_v35, %v390_v32  ;;  %v2937_v32 = vld [vmem:[#allocation5 + $0x14] ss:$8 sps:$4 sm:$0xff]   ;;  %v2935_v33 = vld [vmem:[#allocation5 + $0x10] ss:$8 sps:$4 sm:$0xff]   ;;  %v2938_v35 = vld [vmem:[#allocation5] ss:$8 sps:$4 sm:$0xff]  }
 0x291   :  { %v539_v39 = vpop.f32.mrf.mxu1 }
 0x292   :  { %v564_v41 = vsub.f32 0.0, %v560_v37  ;;  %v561_v42 = vadd.f32 %v557_v34, %v545_v38  ;;  %v546_v46 = vadd.f32 %v539_v39, %v392_v36  ;;  %v2943_v36 = vld [vmem:[#allocation5 + $0xf4] ss:$8 sps:$4 sm:$0xff]   ;;  %v2946_v38 = vld [vmem:[#allocation5 + $0xe4] ss:$8 sps:$4 sm:$0xff]  }
 0x293   :  { %v541_v47 = vpop.f32.mrf.mxu1  ;;  %v2944_v39 = vld [vmem:[#allocation5 + $0xe0] ss:$8 sps:$4 sm:$0xff]  }
 0x294   :  { %v568_v48 = vmin.f32 %v564_v41, 80.0  ;;  %v565_v49 = vsub.f32 0.0, %v561_v42  ;;  %v562_v50 = vadd.f32 %v553_v30, %v546_v46  ;;  %v547_v43 = vadd.f32 %v541_v47, %v394_v40  ;;  %v2934_v30 = vld [vmem:[#allocation5 + $0x24] ss:$8 sps:$4 sm:$0xff]   ;;  %v2949_v40 = vld [vmem:[#allocation5 + $0xd4] ss:$8 sps:$4 sm:$0xff]  }
 0x295   :  { %v2947_v41 = vld [vmem:[#allocation5 + $0xd0] ss:$8 sps:$4 sm:$0xff]   ;;  %v2950_v46 = vld [vmem:[#allocation5 + $0xc0] ss:$8 sps:$4 sm:$0xff]   ;;  %v2955_v47 = vld [vmem:[#allocation5 + $0xb4] ss:$8 sps:$4 sm:$0xff]  }
 0x296   :  { %v572_v51 = vmul.f32 1.442695, %v568_v48  ;;  %v569_v52 = vmin.f32 %v565_v49, 80.0  ;;  %v566_v53 = vsub.f32 0.0, %v562_v50  ;;  %v563_v54 = vadd.f32 %v557_v34, %v547_v43  ;;  %v2940_v34 = vld [vmem:[#allocation5 + $0x4] ss:$8 sps:$4 sm:$0xff]  }
 0x297   :  { %v2953_v48 = vld [vmem:[#allocation5 + $0xb0] ss:$8 sps:$4 sm:$0xff]   ;;  %v2958_v49 = vld [vmem:[#allocation5 + $0xa4] ss:$8 sps:$4 sm:$0xff]   ;;  %v2961_v43 = vld [vmem:[#allocation5 + $0x94] ss:$8 sps:$4 sm:$0xff]  }
 0x298   :  { %3077 = vpow2.f32 %v572_v51  ;;  %v574_v55 = vmul.f32 1.442695, %v569_v52  ;;  %v570_v44 = vmin.f32 %v566_v53, 80.0  ;;  %v567_v56 = vsub.f32 0.0, %v563_v54  ;;  %v2959_v51 = vld [vmem:[#allocation5 + $0x90] ss:$8 sps:$4 sm:$0xff]  }
 0x299   :  { %v2964_v52 = vld [vmem:[#allocation5 + $0x84] ss:$8 sps:$4 sm:$0xff]   ;;  %v2962_v53 = vld [vmem:[#allocation5 + $0x80] ss:$8 sps:$4 sm:$0xff]  }
 0x29a   :  { %3079 = vpow2.f32 %v574_v55  ;;  %v576_v57 = vmul.f32 1.442695, %v570_v44  ;;  %v571_v58 = vmin.f32 %v567_v56, 80.0 }
 0x29c   :  { %3081 = vpow2.f32 %v576_v57  ;;  %v578_v45 = vmul.f32 1.442695, %v571_v58  ;;  %v2965_v57 = vld [vmem:[#allocation5 + $0x270] ss:$8 sps:$4 sm:$0xff]  }
 0x29e   :  { %3083 = vpow2.f32 %v578_v45 }
 0x2a5   :  { %v3078_v59 = vpop.eup %3077 }
 0x2a6   :  { %v580_v60 = vadd.f32 1.0, %v3078_v59  ;;  %v2970_v59 = vld [vmem:[#allocation5 + $0x264] ss:$8 sps:$4 sm:$0xff]  }
 0x2a7   :  { %v3080_v61 = vpop.eup %3079 }
 0x2a8   :  { %v581_v62 = vadd.f32 1.0, %v3080_v61  ;;  %3085 = vrcp.f32 %v580_v60  ;;  %v2968_v61 = vld [vmem:[#allocation5 + $0x260] ss:$8 sps:$4 sm:$0xff]  }
 0x2a9   :  { %v3082_v63 = vpop.eup %3081 }
 0x2aa   :  { %v582_v1 = vadd.f32 1.0, %v3082_v63  ;;  %3087 = vrcp.f32 %v581_v62  ;;  %v2973_v63 = vld [vmem:[#allocation5 + $0x254] ss:$8 sps:$4 sm:$0xff]  }
 0x2ab   :  { %v3084_v2 = vpop.eup %3083 }
 0x2ac   :  { %3089 = vrcp.f32 %v582_v1  ;;  %v583_v3 = vadd.f32 1.0, %v3084_v2 }
 0x2ae   :  { %3091 = vrcp.f32 %v583_v3 }
 0x2b5   :  { %v3086_v4 = vpop.eup %3085 }
 0x2b6   :  { %v588_v7 = vmul.f32 %v3086_v4, %v560_v37  ;;  %v2941_v37 = vld [vmem:[#allocation5 + $0xf0] ss:$8 sps:$4 sm:$0xff]  }
 0x2b7   :  { %v3088_v5 = vpop.eup %3087 }
 0x2b8   :  { %v589_v10 = vmul.f32 %v3088_v5, %v561_v42  ;;  %v2952_v42 = vld [vmem:[#allocation5 + $0xc4] ss:$8 sps:$4 sm:$0xff]   ;;  %v2971_v5 = vld [vmem:[#allocation5 + $0x250] ss:$8 sps:$4 sm:$0xff]  }
 0x2b9   :  { %v3090_v6 = vpop.eup %3089 }
 0x2ba   :  { %v590_v8 = vmul.f32 %v3090_v6, %v562_v50  ;;  %v2956_v50 = vld [vmem:[#allocation5 + $0xa0] ss:$8 sps:$4 sm:$0xff]   ;;  %v2976_v6 = vld [vmem:[#allocation5 + $0x244] ss:$8 sps:$4 sm:$0xff]  }
 0x2bb   :  { %v3092_v9 = vpop.eup %3091 }
 0x2bc   :  { %v3346_v11 = vpack.c.bf16 %v590_v8, %v588_v7  ;;  %v591_v12 = vmul.f32 %v3092_v9, %v563_v54  ;;  %v2967_v54 = vld [vmem:[#allocation5 + $0x274] ss:$8 sps:$4 sm:$0xff]   ;;  %v2974_v8 = vld [vmem:[#allocation5 + $0x240] ss:$8 sps:$4 sm:$0xff]  }
 0x2bd   :  { %v2979_v9 = vld [vmem:[#allocation5 + $0x234] ss:$8 sps:$4 sm:$0xff]  }
 0x2be   :  { %v593_v13 = vpack.c.bf16 %v591_v12, %v589_v10  ;;  %v2488_v10 = vld [vmem:[%s3561_s4 + $0x8] sm:$0xf]  ;;  %v2977_v12 = vld [vmem:[#allocation5 + $0x230] ss:$8 sps:$4 sm:$0xff]   ;;  %s3165_s4 = scalar_lea.vmem %s2373_s15, 32 }
 0x2bf   :  { %p3166_p1 = scmp.ne.s32.totalorder %s2373_s15, %s3165_s4  ;;  %p3171_p3 = scmp.lt.s32.totalorder %s3165_s4, %s3165_s4 }
 0x2c0   :  { %613 = vmatprep.subr.bf16.mxu0 %v593_v13  ;;  %1176 = vmatprep.subr.bf16.mxu1 %v593_v13 }
 0x2c1   :  { %614 = vmatpush1.bf16.msra.mxu0 %v3346_v11  ;;  %p3172_p4 = por %p3171_p3, %p3170_p2 }
 0x2c2   :  { %693 = vmatprep.subr.bf16.mxu0 %v593_v13  ;;  %v2982_v13 = vld [vmem:[#allocation5 + $0x224] ss:$8 sps:$4 sm:$0xff]  }
 0x2c3   :  { %p3173_p5 = pnand %p3172_p4, %p3166_p1 }
 0x2c4   :  { %2421 = vmatmul.mubr.msk.bf16.vlgmr.msra.gmra.mxu0 %vm595_vm3, %v594_v14  ;;  %v2985_v14 = vld [vmem:[#allocation5 + $0x214] ss:$8 sps:$4 sm:$0xff]  }
 0x2c5   :  { %694 = vmatpush1.bf16.msra.mxu0 %v3346_v11  ;;  %711 = vmatprep.mubr.bf16.mxu0 %v3200_v18 }
 0x2c6   :  { %1116 = vmatprep.subr.bf16.mxu0 %v2919_v15  ;;  %v2983_v15 = vld [vmem:[#allocation5 + $0x210] ss:$8 sps:$4 sm:$0xff]  }
 0x2cc   :  { %2423 = vmatmul.mubr.msk.bf16.vlgmr.msra.gmra.mxu0 %vm595_vm3, %v2422_v16  ;;  %v2988_v16 = vld [vmem:[#allocation5 + $0x204] ss:$8 sps:$4 sm:$0xff]  }
 0x2cd   :  { %1117 = vmatpush1.bf16.msra.mxu0 %v2917_v17  ;;  %v2986_v17 = vld [vmem:[#allocation5 + $0x200] ss:$8 sps:$4 sm:$0xff]  }
 0x2ce   :  { %1118 = vmatprep.subr.bf16.mxu0 %v2922_v19  ;;  %v2991_v19 = vld [vmem:[#allocation5 + $0x2f4] ss:$8 sps:$4 sm:$0xff]  }
 0x2d1   :  { %1119 = vmatpush1.bf16.msra.mxu0 %v2920_v20  ;;  %v2989_v20 = vld [vmem:[#allocation5 + $0x2f0] ss:$8 sps:$4 sm:$0xff]  }
 0x2d2   :  { %1120 = vmatprep.subr.bf16.mxu0 %v2925_v21  ;;  %v2994_v21 = vld [vmem:[#allocation5 + $0x2e4] ss:$8 sps:$4 sm:$0xff]  }
 0x2d5   :  { %1121 = vmatpush1.bf16.msra.mxu0 %v2923_v22  ;;  %v2992_v22 = vld [vmem:[#allocation5 + $0x2e0] ss:$8 sps:$4 sm:$0xff]  }
 0x2d6   :  { %1122 = vmatprep.subr.bf16.mxu0 %v2928_v24  ;;  %v2997_v24 = vld [vmem:[#allocation5 + $0x2d4] ss:$8 sps:$4 sm:$0xff]  }
 0x2d9   :  { %1123 = vmatpush1.bf16.msra.mxu0 %v2926_v26  ;;  %v2995_v26 = vld [vmem:[#allocation5 + $0x2d0] ss:$8 sps:$4 sm:$0xff]  }
 0x2da   :  { %1124 = vmatprep.subr.bf16.mxu0 %v2931_v28  ;;  %v3000_v28 = vld [vmem:[#allocation5 + $0x2c4] ss:$8 sps:$4 sm:$0xff]  }
 0x2dd   :  { %1125 = vmatpush1.bf16.msra.mxu0 %v2929_v29  ;;  %v2998_v29 = vld [vmem:[#allocation5 + $0x2c0] ss:$8 sps:$4 sm:$0xff]  }
 0x2de   :  { %1126 = vmatprep.subr.bf16.mxu0 %v2934_v30  ;;  %v3003_v30 = vld [vmem:[#allocation5 + $0x2b4] ss:$8 sps:$4 sm:$0xff]  }
 0x2e1   :  { %1127 = vmatpush1.bf16.msra.mxu0 %v2932_v31  ;;  %v3001_v31 = vld [vmem:[#allocation5 + $0x2b0] ss:$8 sps:$4 sm:$0xff]  }
 0x2e2   :  { %1128 = vmatprep.subr.bf16.mxu0 %v2937_v32  ;;  %v3006_v32 = vld [vmem:[#allocation5 + $0x2a4] ss:$8 sps:$4 sm:$0xff]  }
 0x2e5   :  { %1129 = vmatpush1.bf16.msra.mxu0 %v2935_v33  ;;  %v3004_v33 = vld [vmem:[#allocation5 + $0x2a0] ss:$8 sps:$4 sm:$0xff]  }
 0x2e6   :  { %1130 = vmatprep.subr.bf16.mxu0 %v2940_v34  ;;  %v3009_v34 = vld [vmem:[#allocation5 + $0x294] ss:$8 sps:$4 sm:$0xff]  }
 0x2e9   :  { %1131 = vmatpush1.bf16.msra.mxu0 %v2938_v35  ;;  %v3007_v35 = vld [vmem:[#allocation5 + $0x290] ss:$8 sps:$4 sm:$0xff]  }
 0x2ea   :  { %1132 = vmatprep.subr.bf16.mxu0 %v2943_v36  ;;  %v3012_v36 = vld [vmem:[#allocation5 + $0x284] ss:$8 sps:$4 sm:$0xff]  }
 0x2ed   :  { %1133 = vmatpush2.bf16.msra.mxu0 %v2941_v37  ;;  %v3010_v37 = vld [vmem:[#allocation5 + $0x280] ss:$8 sps:$4 sm:$0xff]  }
 0x2ee   :  { %1134 = vmatprep.subr.bf16.mxu0 %v2946_v38 }
 0x2f1   :  { %1135 = vmatpush2.bf16.msra.mxu0 %v2944_v39 }
 0x2f2   :  { %1136 = vmatprep.subr.bf16.mxu0 %v2949_v40 }
 0x2f5   :  { %1137 = vmatpush2.bf16.msra.mxu0 %v2947_v41 }
 0x2f6   :  { %1138 = vmatprep.subr.bf16.mxu0 %v2952_v42 }
 0x2f9   :  { %1139 = vmatpush2.bf16.msra.mxu0 %v2950_v46 }
 0x2fa   :  { %1140 = vmatprep.subr.bf16.mxu0 %v2955_v47 }
 0x2fd   :  { %1141 = vmatpush2.bf16.msra.mxu0 %v2953_v48 }
 0x2fe   :  { %1142 = vmatprep.subr.bf16.mxu0 %v2958_v49 }
 0x301   :  { %1143 = vmatpush2.bf16.msra.mxu0 %v2956_v50 }
 0x302   :  { %1144 = vmatprep.subr.bf16.mxu0 %v2961_v43 }
 0x305   :  { %1145 = vmatpush2.bf16.msra.mxu0 %v2959_v51 }
 0x306   :  { %1146 = vmatprep.subr.bf16.mxu0 %v2964_v52 }
 0x309   :  { %1147 = vmatpush2.bf16.msra.mxu0 %v2962_v53 }
 0x30a   :  { %1398 = vmatprep.subr.bf16.mxu0 %v2967_v54 }
 0x384   :  { %v633_v55 = vpop.f32.mrf.mxu0 }
 0x385   :  { %v640_v58 = vpack.c.bf16 %v633_v55, %v633_v55 }
 0x386   :  { %v635_v44 = vpop.f32.mrf.mxu0 }
 0x387   :  { %v641_v56 = vpack.c.bf16 %v635_v44, %v635_v44  ;;  %v1441_v44 = vld [vmem:[%s3563_s6] sm:$0x3] }
 0x388   :  { %v637_v45 = vpop.f32.mrf.mxu0 }
 0x389   :  { %1148 = vmatprep.mubr.bf16.mxu0 %v641_v56  ;;  %v1446_v56 = vrot.slane %v1441_v44, %v552_v25  ;;  %v1450_v45 = vrot.slane %v1441_v44, %v556_v27  ;;  %v3058_v44 = vld [vmem:[%s3565_s8 + $0x100] sm:$0xff]  }
 0x38a   :  { %v638_v60 = vpop.f32.mrf.mxu0  ;;  %1149 = vmatmul.mubr.bf16.vlgmr.msra.gmra.mxu0 %v640_v58 }
 0x38b   :  { %1399 = vmatpush1.bf16.msra.mxu0 %v2965_v57 }
 0x38c   :  { %v713_v62 = vpop.f32.mrf.mxu0  ;;  %1400 = vmatprep.subr.bf16.mxu0 %v2970_v59 }
 0x38d   :  { %v720_v3 = vpack.c.bf16 %v713_v62, %v713_v62 }
 0x38e   :  { %v715_v1 = vpop.f32.mrf.mxu0 }
 0x38f   :  { %v721_v2 = vpack.c.bf16 %v715_v1, %v715_v1  ;;  %1401 = vmatpush1.bf16.msra.mxu0 %v2968_v61 }
 0x390   :  { %v717_v4 = vpop.f32.mrf.mxu0  ;;  %1402 = vmatprep.subr.bf16.mxu0 %v2973_v63 }
 0x391   :  { %947 = vmatprep.mubr.bf16.mxu1 %v721_v2 }
 0x392   :  { %v718_v7 = vpop.f32.mrf.mxu0  ;;  %948 = vmatmul.mubr.bf16.vlgmr.msra.gmra.mxu1 %v720_v3 }
 0x393   :  { %1177 = vmatpush1.bf16.msra.mxu1 %v3346_v11  ;;  %1194 = vmatprep.mubr.bf16.mxu1 %v3200_v18  ;;  %v2980_v11 = vld [vmem:[#allocation5 + $0x220] ss:$8 sps:$4 sm:$0xff]  }
 0x394   :  { %1403 = vmatpush1.bf16.msra.mxu0 %v2971_v5 }
 0x395   :  { %1404 = vmatprep.subr.bf16.mxu0 %v2976_v6 }
 0x398   :  { %1405 = vmatpush1.bf16.msra.mxu0 %v2974_v8 }
 0x399   :  { %1406 = vmatprep.subr.bf16.mxu0 %v2979_v9 }
 0x39a   :  { %2489 = vmatmul.mubr.msk.bf16.vlgmr.msra.gmra.mxu1 %vm595_vm3, %v2488_v10 }
 0x39b   :  { %1515 = vmatprep.mubr.bf16.mxu1 %v3200_v18 }
 0x39c   :  { %1407 = vmatpush1.bf16.msra.mxu0 %v2977_v12 }
 0x39d   :  { %1408 = vmatprep.subr.bf16.mxu0 %v2982_v13 }
 0x3a0   :  { %1409 = vmatpush1.bf16.msra.mxu0 %v2980_v11 }
 0x3a1   :  { %1410 = vmatprep.subr.bf16.mxu0 %v2985_v14 }
 0x3a4   :  { %1411 = vmatpush1.bf16.msra.mxu0 %v2983_v15 }
 0x3a5   :  { %1412 = vmatprep.subr.bf16.mxu0 %v2988_v16  ;;  %v1471_v16 = vld [vmem:[%s3564_s7] sm:$0x3] }
 0x3a8   :  { %1413 = vmatpush1.bf16.msra.mxu0 %v2986_v17  ;;  %v2591_v17 = vld [vmem:[%s3564_s7 + $0x4] sm:$0x3] }
 0x3a9   :  { %1414 = vmatprep.subr.bf16.mxu0 %v2991_v19  ;;  %v3013_v19 = vld [vmem:[%s3565_s8 + $0xf8] sm:$0xff]  }
 0x3ac   :  { %1415 = vmatpush2.bf16.msra.mxu0 %v2989_v20  ;;  %v2524_v20 = vld [vmem:[%s3564_s7 + $0x2] sm:$0x3] }
 0x3ad   :  { %1416 = vmatprep.subr.bf16.mxu0 %v2994_v21  ;;  %v3014_v21 = vld [vmem:[%s3565_s8 + $0xb8] sm:$0xff]  }
 0x3b0   :  { %1417 = vmatpush2.bf16.msra.mxu0 %v2992_v22  ;;  %v3015_v22 = vld [vmem:[%s3565_s8 + $0xf0] sm:$0xff]  }
 0x3b1   :  { %1418 = vmatprep.subr.bf16.mxu0 %v2997_v24  ;;  %v3016_v24 = vld [vmem:[%s3565_s8 + $0xb0] sm:$0xff]  }
 0x3b4   :  { %1419 = vmatpush2.bf16.msra.mxu0 %v2995_v26  ;;  %v3018_v26 = vld [vmem:[%s3565_s8 + $0xa8] sm:$0xff]  }
 0x3b5   :  { %1420 = vmatprep.subr.bf16.mxu0 %v3000_v28  ;;  %v3019_v28 = vld [vmem:[%s3565_s8 + $0xe0] sm:$0xff]  }
 0x3b8   :  { %1421 = vmatpush2.bf16.msra.mxu0 %v2998_v29  ;;  %v3020_v29 = vld [vmem:[%s3565_s8 + $0xa0] sm:$0xff]  }
 0x3b9   :  { %1422 = vmatprep.subr.bf16.mxu0 %v3003_v30  ;;  %v3021_v30 = vld [vmem:[%s3565_s8 + $0xd8] sm:$0xff]  }
 0x3bc   :  { %1423 = vmatpush2.bf16.msra.mxu0 %v3001_v31  ;;  %v3022_v31 = vld [vmem:[%s3565_s8 + $0x98] sm:$0xff]  }
 0x3bd   :  { %1424 = vmatprep.subr.bf16.mxu0 %v3006_v32  ;;  %v3023_v32 = vld [vmem:[%s3565_s8 + $0xd0] sm:$0xff]  }
 0x3c0   :  { %1425 = vmatpush2.bf16.msra.mxu0 %v3004_v33  ;;  %v3024_v33 = vld [vmem:[%s3565_s8 + $0x90] sm:$0xff]  }
 0x3c1   :  { %1426 = vmatprep.subr.bf16.mxu0 %v3009_v34  ;;  %v3025_v34 = vld [vmem:[%s3565_s8 + $0xc8] sm:$0xff]  }
 0x3c4   :  { %1427 = vmatpush2.bf16.msra.mxu0 %v3007_v35  ;;  %v3026_v35 = vld [vmem:[%s3565_s8 + $0x88] sm:$0xff]  }
 0x3c5   :  { %1428 = vmatprep.subr.bf16.mxu0 %v3012_v36  ;;  %v3029_v36 = vld [vmem:[%s3565_s8 + $0x178] sm:$0xff]  }
 0x3c8   :  { %1429 = vmatpush2.bf16.msra.mxu0 %v3010_v37  ;;  %v3030_v37 = vld [vmem:[%s3565_s8 + $0x138] sm:$0xff]  }
 0x44a   :  { %v1150_v38 = vpop.f32.mrf.mxu0 }
 0x44c   :  { %v1152_v39 = vpop.f32.mrf.mxu0 }
 0x44e   :  { %v1154_v40 = vpop.f32.mrf.mxu0 }
 0x44f   :  { %v3033_v40 = vld [vmem:[%s3565_s8 + $0x170] sm:$0xff]  }
 0x450   :  { %v1155_v41 = vpop.f32.mrf.mxu0 }
 0x451   :  { %v3034_v41 = vld [vmem:[%s3565_s8 + $0x130] sm:$0xff]  }
 0x452   :  { %v949_v42 = vpop.f32.mrf.mxu1 }
 0x453   :  { %v1151_v46 = vadd.f32 %v1150_v38, %v949_v42  ;;  %v3027_v38 = vld [vmem:[%s3565_s8 + $0xc0] sm:$0xff]   ;;  %v3031_v42 = vld [vmem:[%s3565_s8 + $0x78] sm:$0xff]  }
 0x454   :  { %v951_v47 = vpop.f32.mrf.mxu1 }
 0x455   :  { %v1153_v48 = vadd.f32 %v1152_v39, %v951_v47  ;;  %v3028_v39 = vld [vmem:[%s3565_s8 + $0x80] sm:$0xff]   ;;  %v3038_v47 = vld [vmem:[%s3565_s8 + $0x128] sm:$0xff]  }
 0x456   :  { %v953_v49 = vpop.f32.mrf.mxu1 }
 0x457   :  { %v3042_v49 = vld [vmem:[%s3565_s8 + $0x120] sm:$0xff]  }
 0x458   :  { %v954_v50 = vpop.f32.mrf.mxu1 }
 0x459   :  { %v3045_v50 = vld [vmem:[%s3565_s8 + $0x158] sm:$0xff]  }
 0x45a   :  { %v1196_v43 = vpop.f32.mrf.mxu1 }
 0x45b   :  { %v1203_v53 = vpack.c.bf16 %v1196_v43, %v1196_v43  ;;  %v3046_v43 = vld [vmem:[%s3565_s8 + $0x118] sm:$0xff]  }
 0x45c   :  { %v1198_v51 = vpop.f32.mrf.mxu1 }
 0x45d   :  { %v1204_v52 = vpack.c.bf16 %v1198_v51, %v1198_v51  ;;  %v3049_v51 = vld [vmem:[%s3565_s8 + $0x150] sm:$0xff]  }
 0x45e   :  { %v1200_v54 = vpop.f32.mrf.mxu1 }
 0x45f   :  { %1430 = vmatprep.mubr.bf16.mxu0 %v1204_v52  ;;  %v3050_v52 = vld [vmem:[%s3565_s8 + $0x110] sm:$0xff]   ;;  %v3054_v54 = vld [vmem:[%s3565_s8 + $0x108] sm:$0xff]  }
 0x460   :  { %v1201_v55 = vpop.f32.mrf.mxu1  ;;  %1431 = vmatmul.mubr.bf16.vlgmr.msra.gmra.mxu0 %v1203_v53  ;;  %v3053_v53 = vld [vmem:[%s3565_s8 + $0x148] sm:$0xff]  }
 0x461   :  { %1948 = vmatprep.mubr.bf16.mxu0 %v3200_v18  ;;  %v3057_v55 = vld [vmem:[%s3565_s8 + $0x140] sm:$0xff]  }
 0x520   :  { %v1432_v57 = vpop.f32.mrf.mxu0 }
 0x521   :  { %v1439_v58 = vadd.f32 %v1432_v57, %v1151_v46  ;;  %v3037_v46 = vld [vmem:[%s3565_s8 + $0x168] sm:$0xff]  }
 0x522   :  { %v1434_v59 = vpop.f32.mrf.mxu0 }
 0x523   :  { %v1453_v60 = vadd.f32 %v1446_v56, %v1439_v58  ;;  %v1440_v61 = vadd.f32 %v1434_v59, %v1153_v48  ;;  %v3041_v48 = vld [vmem:[%s3565_s8 + $0x160] sm:$0xff]  }
 0x524   :  { %v1436_v62 = vpop.f32.mrf.mxu0 }
 0x525   :  { %v1455_v63 = vsub.f32 0.0, %v1453_v60  ;;  %v1454_v1 = vadd.f32 %v1450_v45, %v1440_v61 }
 0x526   :  { %v1437_v2 = vpop.f32.mrf.mxu0 }
 0x527   :  { %v1457_v3 = vmin.f32 %v1455_v63, 80.0  ;;  %v1456_v4 = vsub.f32 0.0, %v1454_v1 }
 0x529   :  { %v1459_v5 = vmul.f32 1.442695, %v1457_v3  ;;  %v1458_v6 = vmin.f32 %v1456_v4, 80.0 }
 0x52b   :  { %3093 = vpow2.f32 %v1459_v5  ;;  %v1461_v7 = vmul.f32 1.442695, %v1458_v6  ;;  %v3032_v5 = vld [vmem:[%s3565_s8 + $0x38] sm:$0xff]  }
 0x52d   :  { %3095 = vpow2.f32 %v1461_v7 }
 0x538   :  { %v3094_v25 = vpop.eup %3093 }
 0x539   :  { %v1463_v8 = vadd.f32 1.0, %v3094_v25  ;;  %v3035_v25 = vld [vmem:[%s3565_s8 + $0x70] sm:$0xff]  }
 0x53a   :  { %v3096_v9 = vpop.eup %3095 }
 0x53b   :  { %3097 = vrcp.f32 %v1463_v8  ;;  %v1464_v23 = vadd.f32 1.0, %v3096_v9 }
 0x53d   :  { %3099 = vrcp.f32 %v1464_v23  ;;  %v3036_v23 = vld [vmem:[%s3565_s8 + $0x30] sm:$0xff]  }
 0x548   :  { %v3098_v27 = vpop.eup %3097 }
 0x549   :  { %v1467_v10 = vmul.f32 %v3098_v27, %v1453_v60  ;;  %v3039_v27 = vld [vmem:[%s3565_s8 + $0x68] sm:$0xff]  }
 0x54a   :  { %v3100_v12 = vpop.eup %3099 }
 0x54b   :  { %v1469_v13 = vpack.c.bf16 %v1467_v10, %v1467_v10  ;;  %v1468_v11 = vmul.f32 %v3100_v12, %v1454_v1  ;;  %v3040_v10 = vld [vmem:[%s3565_s8 + $0x28] sm:$0xff]   ;;  %v3043_v12 = vld [vmem:[%s3565_s8 + $0x60] sm:$0xff]  }
 0x54d   :  { %v1470_v14 = vpack.c.bf16 %v1468_v11, %v1468_v11  ;;  %v1478_v15 = vsel %vm1476_vm4, %v1469_v13, 0  ;;  %v3044_v13 = vld [vmem:[%s3565_s8 + $0x20] sm:$0xff]   ;;  %v3047_v11 = vld [vmem:[%s3565_s8 + $0x58] sm:$0xff]  }
 0x54f   :  { %2522 = vmatprep.subr.msk.bf16.mxu1 %vm1476_vm4, %v1470_v14  ;;  %2592 = vmatprep.subr.msk.bf16.mxu0 %vm1476_vm4, %v1470_v14 }
 0x550   :  { %1498 = vmatpush1.bf16.msra.mxu1 %v1478_v15  ;;  %1931 = vmatpush1.bf16.msra.mxu0 %v1478_v15 }
 0x551   :  { %2525 = vmatprep.subr.msk.bf16.mxu1 %vm1476_vm4, %v1470_v14  ;;  %2713 = vmatprep.subr.bf16.mxu0 %v3029_v36  ;;  %v3048_v14 = vld [vmem:[%s3565_s8 + $0x18] sm:$0xff]   ;;  %v3072_v36 = vld [vmem:[#allocation7 + $0x50] sm:$0xff]  }
 0x553   :  { %2523 = vmatmul.mubr.msk.bf16.vlgmr.msra.gmra.mxu1 %vm1472_vm5, %v1471_v16  ;;  %2593 = vmatmul.mubr.msk.bf16.vlgmr.msra.gmra.mxu0 %vm1472_vm5, %v2591_v17  ;;  %v3052_v16 = vld [vmem:[%s3565_s8 + $0x10] sm:$0xff]   ;;  %v3055_v17 = vld [vmem:[%s3565_s8 + $0x48] sm:$0xff]  }
 0x554   :  { %1578 = vmatpush1.bf16.msra.mxu1 %v1478_v15  ;;  %1595 = vmatprep.mubr.bf16.mxu1 %v3200_v18  ;;  %v3017_v18 = vld [vmem:[%s3565_s8 + $0xe8] sm:$0xff]   ;;  %v3051_v15 = vld [vmem:[%s3565_s8 + $0x50] sm:$0xff]  }
 0x555   :  { %2669 = vmatprep.subr.bf16.mxu1 %v3013_v19  ;;  %2714 = vmatpush3.bf16.msra.mxu0 %v3030_v37  ;;  %v3056_v19 = vld [vmem:[%s3565_s8 + $0x8] sm:$0xff]  }
 0x556   :  { %2715 = vmatprep.subr.bf16.mxu0 %v3033_v40  ;;  %v3073_v37 = vld [vmem:[#allocation7 + $0x8] sm:$0xff]   ;;  %v3076_v40 = vld [vmem:[#allocation7 + $0x40] sm:$0xff]  }
 0x559   :  { %2716 = vmatpush3.bf16.msra.mxu0 %v3034_v41 }
 0x55a   :  { %2717 = vmatprep.subr.bf16.mxu0 %v3037_v46 }
 0x55b   :  { %2526 = vmatmul.mubr.msk.bf16.vlgmr.msra.gmra.mxu1 %vm1472_vm5, %v2524_v20  ;;  %v3059_v20 = vld [vmem:[%s3565_s8 + $0x40] sm:$0xff]  }
 0x55c   :  { %2670 = vmatpush3.bf16.msra.mxu1 %v3014_v21  ;;  %v3060_v21 = vld [vmem:[%s3565_s8] sm:$0xff]  }
 0x55d   :  { %2671 = vmatprep.subr.bf16.mxu1 %v3015_v22  ;;  %2718 = vmatpush3.bf16.msra.mxu0 %v3038_v47 }
 0x55e   :  { %2719 = vmatprep.subr.bf16.mxu0 %v3041_v48 }
 0x560   :  { %2672 = vmatpush3.bf16.msra.mxu1 %v3016_v24  ;;  %v3061_v24 = vld [vmem:[#allocation7 + $0x38] sm:$0xff]  }
 0x561   :  { %2673 = vmatprep.subr.bf16.mxu1 %v3017_v18  ;;  %2720 = vmatpush3.bf16.msra.mxu0 %v3042_v49  ;;  %v3062_v18 = vld [vmem:[#allocation7 + $0x78] sm:$0xff]  }
 0x562   :  { %2721 = vmatprep.subr.bf16.mxu0 %v3045_v50 }
 0x564   :  { %2674 = vmatpush3.bf16.msra.mxu1 %v3018_v26  ;;  %v3063_v26 = vld [vmem:[#allocation7 + $0x30] sm:$0xff]  }
 0x565   :  { %2675 = vmatprep.subr.bf16.mxu1 %v3019_v28  ;;  %2722 = vmatpush3.bf16.msra.mxu0 %v3046_v43  ;;  %v3064_v28 = vld [vmem:[#allocation7 + $0x70] sm:$0xff]  }
 0x566   :  { %2723 = vmatprep.subr.bf16.mxu0 %v3049_v51 }
 0x568   :  { %2676 = vmatpush3.bf16.msra.mxu1 %v3020_v29  ;;  %v3065_v29 = vld [vmem:[#allocation7 + $0x28] sm:$0xff]  }
 0x569   :  { %2677 = vmatprep.subr.bf16.mxu1 %v3021_v30  ;;  %2724 = vmatpush3.bf16.msra.mxu0 %v3050_v52  ;;  %v3066_v30 = vld [vmem:[#allocation7 + $0x68] sm:$0xff]  }
 0x56a   :  { %2725 = vmatprep.subr.bf16.mxu0 %v3053_v53 }
 0x56c   :  { %2678 = vmatpush3.bf16.msra.mxu1 %v3022_v31  ;;  %v3067_v31 = vld [vmem:[#allocation7 + $0x20] sm:$0xff]  }
 0x56d   :  { %2679 = vmatprep.subr.bf16.mxu1 %v3023_v32  ;;  %2726 = vmatpush3.bf16.msra.mxu0 %v3054_v54  ;;  %v3068_v32 = vld [vmem:[#allocation7 + $0x60] sm:$0xff]  }
 0x56e   :  { %2727 = vmatprep.subr.bf16.mxu0 %v3057_v55 }
 0x570   :  { %2680 = vmatpush3.bf16.msra.mxu1 %v3024_v33  ;;  %v3069_v33 = vld [vmem:[#allocation7 + $0x18] sm:$0xff]  }
 0x571   :  { %2681 = vmatprep.subr.bf16.mxu1 %v3025_v34  ;;  %2728 = vmatpush3.bf16.msra.mxu0 %v3058_v44  ;;  %v3070_v34 = vld [vmem:[#allocation7 + $0x58] sm:$0xff]  }
 0x572   :  { %2797 = vmatprep.subr.bf16.mxu0 %v3198_v0 }
 0x574   :  { %2682 = vmatpush3.bf16.msra.mxu1 %v3026_v35  ;;  %v3071_v35 = vld [vmem:[#allocation7 + $0x10] sm:$0xff]  }
 0x575   :  { %2683 = vmatprep.subr.bf16.mxu1 %v3027_v38  ;;  %v3074_v38 = vld [vmem:[#allocation7 + $0x48] sm:$0xff]  }
 0x578   :  { %2684 = vmatpush3.bf16.msra.mxu1 %v3028_v39  ;;  %v3075_v39 = vld [vmem:[#allocation7] sm:$0xff]  }
 0x579   :  { %2691 = vmatprep.subr.bf16.mxu1 %v3031_v42 }
 0x613   :  { %v1517_v56 = vpop.f32.mrf.mxu1  ;;  %v1950_v57 = vpop.f32.mrf.mxu0 }
 0x614   :  { %v1957_v45 = vpack.c.bf16 %v1950_v57, %v1950_v57  ;;  %v1524_v22 = vpack.c.bf16 %v1517_v56, %v1517_v56 }
 0x615   :  { %v1519_v58 = vpop.f32.mrf.mxu1  ;;  %v1952_v59 = vpop.f32.mrf.mxu0 }
 0x616   :  { %v1958_v60 = vpack.c.bf16 %v1952_v59, %v1952_v59  ;;  %v1525_v8 = vpack.c.bf16 %v1519_v58, %v1519_v58 }
 0x617   :  { %v1521_v61 = vpop.f32.mrf.mxu1  ;;  %v1954_v62 = vpop.f32.mrf.mxu0 }
 0x618   :  { %2120 = vmatprep.mubr.bf16.mxu0 %v1958_v60 }
 0x619   :  { %v1522_v63 = vpop.f32.mrf.mxu1  ;;  %2121 = vmatmul.mubr.bf16.vlgmr.msra.gmra.mxu0 %v1957_v45  ;;  %v1955_v1 = vpop.f32.mrf.mxu0 }
 0x61a   :  { %2813 = vmatprep.mubr.msk.bf16.mxu0 %vm3199_vm0, %v3198_v0  ;;  %2798 = vmatpush3.bf16.msra.mxu0 %v3061_v24 }
 0x61b   :  { %v1597_v2 = vpop.f32.mrf.mxu1  ;;  %2799 = vmatprep.subr.bf16.mxu0 %v3198_v0 }
 0x61c   :  { %v1604_v6 = vpack.c.bf16 %v1597_v2, %v1597_v2 }
 0x61d   :  { %v1599_v3 = vpop.f32.mrf.mxu1 }
 0x61e   :  { %v1605_v4 = vpack.c.bf16 %v1599_v3, %v1599_v3  ;;  %2800 = vmatpush3.bf16.msra.mxu0 %v3063_v26 }
 0x61f   :  { %v1601_v7 = vpop.f32.mrf.mxu1  ;;  %2801 = vmatprep.subr.bf16.mxu0 %v3198_v0 }
 0x620   :  { %1767 = vmatprep.mubr.bf16.mxu1 %v1605_v4  ;;  %v2659_v7 = vld [vmem:[%s3568_s11] ss:$0 sm:$0xff] }
 0x621   :  { %v1602_v9 = vpop.f32.mrf.mxu1  ;;  %1768 = vmatmul.mubr.bf16.vlgmr.msra.gmra.mxu1 %v1604_v6 }
 0x622   :  { %2692 = vmatpush3.bf16.msra.mxu1 %v3032_v5  ;;  %1903 = vmatprep.mubr.bf16.mxu1 %v1525_v8 }
 0x623   :  { %2693 = vmatprep.subr.bf16.mxu1 %v3035_v25  ;;  %2802 = vmatpush3.bf16.msra.mxu0 %v3065_v29 }
 0x624   :  { %2803 = vmatprep.subr.bf16.mxu0 %v3198_v0 }
 0x626   :  { %2694 = vmatpush3.bf16.msra.mxu1 %v3036_v23 }
 0x627   :  { %2695 = vmatprep.subr.bf16.mxu1 %v3039_v27  ;;  %2804 = vmatpush3.bf16.msra.mxu0 %v3067_v31 }
 0x628   :  { %2805 = vmatprep.subr.bf16.mxu0 %v3198_v0 }
 0x62a   :  { %2696 = vmatpush3.bf16.msra.mxu1 %v3040_v10 }
 0x62b   :  { %2697 = vmatprep.subr.bf16.mxu1 %v3043_v12  ;;  %2806 = vmatpush3.bf16.msra.mxu0 %v3069_v33 }
 0x62c   :  { %2807 = vmatprep.subr.bf16.mxu0 %v3198_v0 }
 0x62e   :  { %2698 = vmatpush3.bf16.msra.mxu1 %v3044_v13 }
 0x62f   :  { %2699 = vmatprep.subr.bf16.mxu1 %v3047_v11  ;;  %2808 = vmatpush3.bf16.msra.mxu0 %v3071_v35 }
 0x630   :  { %2809 = vmatprep.subr.bf16.mxu0 %v3198_v0 }
 0x632   :  { %2700 = vmatpush3.bf16.msra.mxu1 %v3048_v14 }
 0x633   :  { %2701 = vmatprep.subr.bf16.mxu1 %v3051_v15  ;;  %2810 = vmatpush3.bf16.msra.mxu0 %v3073_v37 }
 0x634   :  { %2811 = vmatprep.subr.bf16.mxu0 %v3198_v0 }
 0x636   :  { %2702 = vmatpush3.bf16.msra.mxu1 %v3052_v16 }
 0x637   :  { %2703 = vmatprep.subr.bf16.mxu1 %v3055_v17  ;;  %2812 = vmatpush3.bf16.msra.mxu0 %v3075_v39 }
 0x63a   :  { %2704 = vmatpush3.bf16.msra.mxu1 %v3056_v19 }
 0x63b   :  { %2705 = vmatprep.subr.bf16.mxu1 %v3059_v20 }
 0x63e   :  { %2706 = vmatpush3.bf16.msra.mxu1 %v3060_v21 }
 0x63f   :  { %2777 = vmatprep.subr.bf16.mxu1 %v3198_v0 }
 0x641   :  { %1904 = vmatmul.mubr.bf16.vlgmr.msra.gmra.mxu1 %v1524_v22 }
 0x642   :  { %2793 = vmatprep.mubr.msk.bf16.mxu1 %vm3199_vm0, %v3198_v0  ;;  %2778 = vmatpush3.bf16.msra.mxu1 %v3062_v18 }
 0x643   :  { %2779 = vmatprep.subr.bf16.mxu1 %v3198_v0 }
 0x646   :  { %2780 = vmatpush3.bf16.msra.mxu1 %v3064_v28 }
 0x647   :  { %2781 = vmatprep.subr.bf16.mxu1 %v3198_v0 }
 0x64a   :  { %2782 = vmatpush3.bf16.msra.mxu1 %v3066_v30 }
 0x64b   :  { %2783 = vmatprep.subr.bf16.mxu1 %v3198_v0 }
 0x64e   :  { %2784 = vmatpush3.bf16.msra.mxu1 %v3068_v32 }
 0x64f   :  { %2785 = vmatprep.subr.bf16.mxu1 %v3198_v0 }
 0x652   :  { %2786 = vmatpush3.bf16.msra.mxu1 %v3070_v34 }
 0x653   :  { %2787 = vmatprep.subr.bf16.mxu1 %v3198_v0 }
 0x656   :  { %2788 = vmatpush3.bf16.msra.mxu1 %v3072_v36 }
 0x657   :  { %2789 = vmatprep.subr.bf16.mxu1 %v3198_v0 }
 0x65a   :  { %2790 = vmatpush3.bf16.msra.mxu1 %v3074_v38 }
 0x65b   :  { %2791 = vmatprep.subr.bf16.mxu1 %v3198_v0  ;;  %v2642_v0 = vld [vmem:[%s3566_s9] ss:$0 sm:$0xff] }
 0x65e   :  { %2792 = vmatpush3.bf16.msra.mxu1 %v3076_v40 }
 0x6d9   :  { %v2729_v41 = vpop.f32.mrf.mxu0 }
 0x6db   :  { %v2730_v42 = vpop.f32.mrf.mxu0 }
 0x6dc   :  { %v2731_v44 = vadd.f32 %v2730_v42, %v2729_v41 }
 0x6dd   :  { %v2732_v46 = vpop.f32.mrf.mxu0 }
 0x6df   :  { %v2733_v47 = vpop.f32.mrf.mxu0 }
 0x6e1   :  { %v2685_v48 = vpop.f32.mrf.mxu1 }
 0x6e3   :  { %v2686_v49 = vpop.f32.mrf.mxu1 }
 0x6e4   :  { %v2687_v53 = vadd.f32 %v2686_v49, %v2685_v48 }
 0x6e5   :  { %v2688_v50 = vpop.f32.mrf.mxu1 }
 0x6e7   :  { %v2689_v43 = vpop.f32.mrf.mxu1 }
 0x701   :  { %v2707_v51 = vpop.f32.mrf.mxu1 }
 0x703   :  { %v2708_v52 = vpop.f32.mrf.mxu1 }
 0x704   :  { %v2709_v54 = vadd.f32 %v2708_v52, %v2707_v51 }
 0x705   :  { %v2710_v55 = vpop.f32.mrf.mxu1 }
 0x706   :  { %v1906_v56 = vadd.f32 %v2709_v54, %v2687_v53 }
 0x707   :  { %v2711_v57 = vpop.f32.mrf.mxu1 }
 0x708   :  { %v2128_v58 = vadd.f32 %v2731_v44, %v1906_v56 }
 0x70a   :  { %v2136_v45 = vadd.f32 %v2642_v0, %v2128_v58 }
 0x70c   :  { %v2137_v59 = vsub.f32 0.0, %v2136_v45 }
 0x70e   :  { %v2138_v60 = vmin.f32 %v2137_v59, 80.0 }
 0x710   :  { %v2139_v61 = vmul.f32 1.442695, %v2138_v60 }
 0x712   :  { %3101 = vpow2.f32 %v2139_v61 }
 0x71f   :  { %v3102_v62 = vpop.eup %3101 }
 0x720   :  { %v2141_v63 = vadd.f32 1.0, %v3102_v62 }
 0x722   :  { %3103 = vrcp.f32 %v2141_v63 }
 0x72f   :  { %v3104_v1 = vpop.eup %3103 }
 0x730   :  { %v2143_v2 = vmul.f32 %v3104_v1, %v2136_v45 }
 0x732   :  { %v2144_v3 = vpack.c.bf16 %v2143_v2, %v2143_v2 }
 0x734   :  { %2814 = vmatmul.mubr.bf16.vlgmr.msra.gmra.mxu0 %v2144_v3  ;;  %v2179_v4 = vrot.slane %v2144_v3, 1 }
 0x736   :  { %2794 = vmatmul.mubr.bf16.vlgmr.msra.gmra.mxu1 %v2179_v4 }
 0x7f4   :  { %v2351_v5 = vpop.f32.mrf.mxu0 }
 0x7f6   :  { %v2263_v6 = vpop.f32.mrf.mxu1  ;;  %v2815_v25 = vpop.f32.mrf.mxu0 }
 0x7f7   :  { %v2352_v8 = vadd.f32 %v2351_v5, %v2263_v6 }
 0x7f8   :  { %v2795_v9 = vpop.f32.mrf.mxu1  ;;  %v2354_v23 = vpop.f32.mrf.mxu0 }
 0x7f9   :  { %v2364_v27 = vadd.f32 %v2659_v7, %v2352_v8 }
 0x7fa   :  { %v2266_v10 = vpop.f32.mrf.mxu1  ;;  %v2816_v12 = vpop.f32.mrf.mxu0 }
 0x7fb   :  { %2365 = vst [vmem:[#allocation8] sm:$0x3] %v2364_v27 }
 0x7fc   :  { %v2796_v13 = vpop.f32.mrf.mxu1 }
 0x7fd   :  { %3176 = shalt.err (!%p3173_p5)
}
 0x7fe   :  { %2375 = dma.vmem_to_hbm [thread:$0]  %s2373_s15, 32, %s3569_s12, [#allocation4]  }
 0x7ff   :  { %3189 = dma.done.wait [#allocation4], 32  }
 0x800   :  { %3190 = vsyncadd [#allocation4], 4294967264 }
 0x801   :  { %2379 = vsyncpa [#allocation3], 1 }
 0x802   :  { %2380 = vsyncpa [#allocation6], 1 }
 0x803   :  { %2381 = vsyncpa [#allocation4], 1 }

</bundles_post_ra>
